<compile_context>
chip_gen: v5e
topology: v5e:2x2
jax: 0.10.0
libtpu: 0.0.40
codegen_flags: <defaults>
</compile_context>

<pallas_src>
import jax
import jax.numpy as jnp
from jax import lax
from jax.experimental import pallas as pl
from jax.experimental.pallas import tpu as pltpu


def _per_image_grid_default():
    """True on 2-TensorCore chips (v7x-class): keep grid=(N,) 'parallel' so each core takes
    one image.  On single-TC chips (v5e/v6e) fold the batch into the lane axis instead."""
    try:
        kind = jax.devices()[0].device_kind.lower()
    except Exception:
        return False
    return ("v7" in kind) or ("7x" in kind)


def _make_tap_masks(H, W, n_images, inter, dilations):
    """(27, inter, n_images*H*W) f32 boundary masks, one per (dilation, ky, kx) tap.
    Lane layout is image-major / spatial-minor, matching the kernel's flat lane axis."""
    HW = H * W
    q = jnp.arange(HW, dtype=jnp.int32)
    row, col = q // W, q % W
    rows = []
    for d in dilations:
        for ky in (-1, 0, 1):
            for kx in (-1, 0, 1):
                dy, dx = ky * d, kx * d
                valid = ((row + dy >= 0) & (row + dy < H) &
                         (col + dx >= 0) & (col + dx < W))
                rows.append(valid.astype(jnp.float32))
    m = jnp.stack(rows, 0)                        # (27, HW)
    m = jnp.tile(m, (1, n_images))                # (27, L)
    return jnp.broadcast_to(m[:, None, :], (m.shape[0], inter, m.shape[1]))


def _make_aspp_kernel(H, W, inter, dilations, L):
    nb = len(dilations)
    # tap k wants tap[:, p] = h[:, p + off] with off = dy*W + dx; pltpu.roll shift = (-off) % L
    shifts = []
    for d in dilations:
        for ky in (-1, 0, 1):
            for kx in (-1, 0, 1):
                shifts.append((-(ky * d * W + kx * d)) % L)

    def kernel(x_ref, w1_ref, b1_ref, w2_ref, b2_ref, w4_ref, b4_ref, mask_ref, o_ref):
        x = x_ref[0]                                                        # (Cin, L) bf16

        # --- stage 1: the three 1x1 convs fused into ONE bf16 MXU matmul (BN scale folded
        #     into w1 host-side); bias + ReLU stay in f32 ---
        h = jnp.dot(w1_ref[...], x, preferred_element_type=jnp.float32)    # (3*inter, L)
        h = jnp.maximum(h + b1_ref[...], 0.0)

        # --- stage 2: 27-tap im2col via XLU lane rolls * precomputed boundary masks, then
        #     ONE block-diagonal (3*inter, 27*inter) @ (27*inter, L) MXU matmul.
        #     (At larger inter/HW, stage the taps through a VMEM scratch to bound vreg
        #      pressure; at inter=8, L<=512 the concat lives comfortably in VMEM.) ---
        taps = []
        for i in range(nb):
            hb = h[i * inter:(i + 1) * inter]                               # (inter, L) f32
            for t in range(9):
                k = i * 9 + t
                if shifts[k] == 0:
                    taps.append(hb)                                         # center tap
                else:
                    taps.append(pltpu.roll(hb, shift=shifts[k], axis=1) * mask_ref[k])
        t_all = jnp.concatenate(taps, axis=0).astype(jnp.bfloat16)          # (27*inter, L)
        g = jnp.dot(w2_ref[...], t_all, preferred_element_type=jnp.float32)
        g = jnp.maximum(g + b2_ref[...], 0.0)                               # (3*inter, L)

        # --- branch_4: 1x1 conv + folded BN bias, NO ReLU ---
        out = jnp.dot(w4_ref[...], g.astype(jnp.bfloat16),
                      preferred_element_type=jnp.float32)                   # (Cout, L)
        o_ref[0] = (out + b4_ref[...]).astype(o_ref.dtype)

    return kernel


def aspp_forward(x_nchw, params, dilations=(1, 2, 4), per_image_grid=None):
    """x_nchw: (N, Cin, H, W) float32 -> (N, Cout, H, W) float32."""
    w1, s1, b1, w2, s2, b2, w4, s4, b4 = params
    N, Cin, H, W = x_nchw.shape
    inter = w1.shape[1]
    Cout = w4.shape[0]
    HW = H * W
    nb = len(dilations)

    # layout assumptions (lane-dense stores, sublane-aligned channel slices, roll trick)
    assert HW % 128 == 0, "H*W must be a multiple of 128 (lane-dense layout)"
    assert inter % 8 == 0, "inter_planes must be a multiple of 8 (sublane-aligned slices)"
    assert all(0 < d < H and d < W for d in dilations)
    assert w4.shape[1] == nb * inter

    if per_image_grid is None:
        per_image_grid = _per_image_grid_default()

    if per_image_grid:
        # v7x-class: one image per grid step, "parallel" across the two TensorCores.
        grid = (N,)
        L = HW
        n_img_per_step = 1
        x_in = x_nchw.reshape(N, Cin, HW).astype(jnp.bfloat16)
    else:
        # single-TC chips (v5e/v6e): fold the batch into the lane axis -> one wide step.
        grid = (1,)
        L = N * HW
        n_img_per_step = N
        x_in = (jnp.transpose(x_nchw.reshape(N, Cin, HW), (1, 0, 2))
                .reshape(1, Cin, L).astype(jnp.bfloat16))

    # ---- fold eval-mode BN scales into the conv weights host-side (biases stay separate) ----
    w1_mat = (w1.reshape(nb * inter, Cin) * s1[:, None]).astype(jnp.bfloat16)
    w2_blk = jnp.zeros((nb * inter, nb * 9 * inter), jnp.float32)
    for i in range(nb):
        # (O, I, kh, kw) -> (O, kh, kw, I) -> (O, 9*I): tap-major, channel-minor columns,
        # matching the im2col concatenation order inside the kernel.
        w2i = jnp.transpose(w2[i], (0, 2, 3, 1)).reshape(inter, 9 * inter)
        w2i = w2i * (s2[i * inter:(i + 1) * inter])[:, None]
        w2_blk = w2_blk.at[i * inter:(i + 1) * inter,
                           i * 9 * inter:(i + 1) * 9 * inter].set(w2i)
    w2_blk = w2_blk.astype(jnp.bfloat16)
    w4_mat = (w4 * s4[:, None]).astype(jnp.bfloat16)

    col = lambda v: v.reshape(-1, 1).astype(jnp.float32)
    masks = _make_tap_masks(H, W, n_img_per_step, inter, dilations)          # (27, inter, L)

    consts = (w1_mat, col(b1), w2_blk, col(b2), w4_mat, col(b4), masks)

    def full_spec(a):
        nd = a.ndim
        return pl.BlockSpec(a.shape, lambda n, _nd=nd: (0,) * _nd)

    kernel = _make_aspp_kernel(H, W, inter, dilations, L)

    y = pl.pallas_call(
        kernel,
        out_shape=jax.ShapeDtypeStruct((grid[0], Cout, L), jnp.float32),
        grid_spec=pltpu.PrefetchScalarGridSpec(
            num_scalar_prefetch=0,
            grid=grid,
            in_specs=[pl.BlockSpec((1, Cin, L), lambda n: (n, 0, 0))]
                     + [full_spec(a) for a in consts],
            out_specs=pl.BlockSpec((1, Cout, L), lambda n: (n, 0, 0)),
        ),
        compiler_params=pltpu.CompilerParams(dimension_semantics=("parallel",)),
    )(x_in, *consts)

    if per_image_grid:
        return y.reshape(N, Cout, H, W)
    return (jnp.transpose(y.reshape(Cout, N, HW), (1, 0, 2))
            .reshape(N, Cout, H, W))


def make_params(key, in_planes, out_planes):
    inter = in_planes // 4
    ks = jax.random.split(key, 6)
    eps = 1e-5

    def bn_fold(k, c):
        kg, kb, km, kv = jax.random.split(k, 4)
        gamma = 1.0 + 0.1 * jax.random.normal(kg, (c,), jnp.float32)
        beta = 0.1 * jax.random.normal(kb, (c,), jnp.float32)
        mean = 0.1 * jax.random.normal(km, (c,), jnp.float32)
        var = 0.5 + 0.5 * jnp.abs(jax.random.normal(kv, (c,), jnp.float32))
        scale = gamma / jnp.sqrt(var + eps)
        bias = beta - mean * scale
        return scale, bias

    w1 = 0.1 * jax.random.normal(ks[0], (3, inter, in_planes), jnp.float32)    # 3 x 1x1 (O, I)
    w2 = 0.1 * jax.random.normal(ks[1], (3, inter, inter, 3, 3), jnp.float32)  # 3 x 3x3 (O,I,kh,kw)
    w4 = 0.1 * jax.random.normal(ks[2], (out_planes, 3 * inter), jnp.float32)  # final 1x1 (O, I)
    s1, b1 = bn_fold(ks[3], 3 * inter)      # BN of the three stage-1 convs, stacked branch-major
    s2, b2 = bn_fold(ks[4], 3 * inter)      # BN of the three stage-2 convs, stacked branch-major
    s4, b4 = bn_fold(ks[5], out_planes)     # BN of branch_4 (no ReLU)
    return (w1, s1, b1, w2, s2, b2, w4, s4, b4)


def reference_f32(x, params, dilations=(1, 2, 4)):
    """Faithful pure-JAX f32 forward of the PyTorch module (eval-mode BN)."""
    w1, s1, b1, w2, s2, b2, w4, s4, b4 = params
    inter = w1.shape[1]
    hi = lax.Precision.HIGHEST
    outs = []
    for i, d in enumerate(dilations):
        h = jnp.einsum('nchw,oc->nohw', x, w1[i], precision=hi)
        sc = s1[i * inter:(i + 1) * inter].reshape(1, inter, 1, 1)
        bi = b1[i * inter:(i + 1) * inter].reshape(1, inter, 1, 1)
        h = jax.nn.relu(h * sc + bi)
        g = lax.conv_general_dilated(
            h, w2[i], window_strides=(1, 1), padding=[(d, d), (d, d)],
            rhs_dilation=(d, d), dimension_numbers=('NCHW', 'OIHW', 'NCHW'),
            precision=hi)
        sc2 = s2[i * inter:(i + 1) * inter].reshape(1, inter, 1, 1)
        bi2 = b2[i * inter:(i + 1) * inter].reshape(1, inter, 1, 1)
        outs.append(jax.nn.relu(g * sc2 + bi2))
    cat = jnp.concatenate(outs, axis=1)
    out = jnp.einsum('nchw,oc->nohw', cat, w4, precision=hi)
    return out * s4.reshape(1, -1, 1, 1) + b4.reshape(1, -1, 1, 1)


def reference_bf16_matched(x, params, dilations=(1, 2, 4)):
    """Same forward pass, but with BN scales folded into the weights and every conv/matmul
    done with bf16 operands + f32 accumulation -- mirrors the kernel's MXU precision policy."""
    w1, s1, b1, w2, s2, b2, w4, s4, b4 = params
    inter = w1.shape[1]
    bf, f32 = jnp.bfloat16, jnp.float32
    xb = x.astype(bf)
    outs = []
    for i, d in enumerate(dilations):
        w1f = (w1[i] * (s1[i * inter:(i + 1) * inter])[:, None]).astype(bf)
        h = jnp.einsum('nchw,oc->nohw', xb, w1f, preferred_element_type=f32)
        h = jax.nn.relu(h + b1[i * inter:(i + 1) * inter].reshape(1, -1, 1, 1))
        w2f = (w2[i] * (s2[i * inter:(i + 1) * inter]).reshape(-1, 1, 1, 1)).astype(bf)
        g = lax.conv_general_dilated(
            h.astype(bf), w2f, window_strides=(1, 1), padding=[(d, d), (d, d)],
            rhs_dilation=(d, d), dimension_numbers=('NCHW', 'OIHW', 'NCHW'),
            preferred_element_type=f32)
        g = jax.nn.relu(g + b2[i * inter:(i + 1) * inter].reshape(1, -1, 1, 1))
        outs.append(g)
    cat = jnp.concatenate(outs, axis=1)
    w4f = (w4 * s4[:, None]).astype(bf)
    out = jnp.einsum('nchw,oc->nohw', cat.astype(bf), w4f, preferred_element_type=f32)
    return out + b4.reshape(1, -1, 1, 1)


if __name__ == "__main__":
    in_planes, out_planes = 32, 32       # inter_planes = in_planes // 4 = 8
    N, H, W = 2, 16, 16

    key = jax.random.PRNGKey(0)
    k_x, k_p = jax.random.split(key)
    x = jax.random.normal(k_x, (N, in_planes, H, W), jnp.float32)
    params = make_params(k_p, in_planes, out_planes)

    y = jax.block_until_ready(aspp_forward(x, params))
    assert y.shape == (N, out_planes, H, W), y.shape

    # tight check vs. a reference that mirrors the kernel's precision policy
    # (bf16 MXU operands, f32 accumulation, BN scales folded into the weights)
    err_tight = float(jnp.max(jnp.abs(y - reference_bf16_matched(x, params))))
    # loose sanity check vs. the faithful full-f32 forward of the PyTorch module
    err_loose = float(jnp.max(jnp.abs(y - reference_f32(x, params))))

    if err_tight > 5e-3:
        raise RuntimeError(f"mismatch vs bf16-matched reference: max abs err = {err_tight}")
    if err_loose > 1e-1:
        raise RuntimeError(f"mismatch vs f32 reference: max abs err = {err_loose}")

    print("KERNEL_OK")
</pallas_src>

<mosaic_0001>
module attributes {stable_mosaic.version = 11 : i64} {
  func.func @kernel(%arg0: i32, %arg1: memref<1x32x512xbf16, #tpu.memory_space<vmem>>, %arg2: memref<24x32xbf16, #tpu.memory_space<vmem>>, %arg3: memref<24x1xf32, #tpu.memory_space<vmem>>, %arg4: memref<24x216xbf16, #tpu.memory_space<vmem>>, %arg5: memref<24x1xf32, #tpu.memory_space<vmem>>, %arg6: memref<32x24xbf16, #tpu.memory_space<vmem>>, %arg7: memref<32x1xf32, #tpu.memory_space<vmem>>, %arg8: memref<27x8x512xf32, #tpu.memory_space<vmem>>, %arg9: memref<1x32x512xf32, #tpu.memory_space<vmem>>) attributes {dimension_semantics = [#tpu.dimension_semantics<parallel>], iteration_bounds = array<i64: 1>, scalar_prefetch = 0 : i64, scratch_operands = 0 : i64, tpu.core_type = #tpu.core_type<tc>, window_params = [{transform_indices = @transform_0, window_bounds = array<i64: 1, 32, 512>}, {pipeline_mode = #tpu.pipeline_mode<synchronous>, transform_indices = @transform_1, window_bounds = array<i64: 24, 32>}, {pipeline_mode = #tpu.pipeline_mode<synchronous>, transform_indices = @transform_2, window_bounds = array<i64: 24, 1>}, {pipeline_mode = #tpu.pipeline_mode<synchronous>, transform_indices = @transform_3, window_bounds = array<i64: 24, 216>}, {pipeline_mode = #tpu.pipeline_mode<synchronous>, transform_indices = @transform_4, window_bounds = array<i64: 24, 1>}, {pipeline_mode = #tpu.pipeline_mode<synchronous>, transform_indices = @transform_5, window_bounds = array<i64: 32, 24>}, {pipeline_mode = #tpu.pipeline_mode<synchronous>, transform_indices = @transform_6, window_bounds = array<i64: 32, 1>}, {pipeline_mode = #tpu.pipeline_mode<synchronous>, transform_indices = @transform_7, window_bounds = array<i64: 27, 8, 512>}, {transform_indices = @transform_8, window_bounds = array<i64: 1, 32, 512>}]} {
    %c0 = arith.constant 0 : index
    %c0_0 = arith.constant 0 : index
    %c0_1 = arith.constant 0 : index
    %0 = vector.load %arg1[%c0, %c0_0, %c0_1] : memref<1x32x512xbf16, #tpu.memory_space<vmem>>, vector<1x32x512xbf16>
    %1 = vector.shape_cast %0 : vector<1x32x512xbf16> to vector<32x512xbf16>
    %c0_2 = arith.constant 0 : index
    %c0_3 = arith.constant 0 : index
    %2 = vector.load %arg2[%c0_2, %c0_3] : memref<24x32xbf16, #tpu.memory_space<vmem>>, vector<24x32xbf16>
    %cst = arith.constant dense<0.000000e+00> : vector<24x512xf32>
    %3 = tpu.matmul %2, %1, %cst {dimension_numbers = #tpu.dot_dimension_numbers<[1], [0], [0], [1], [0, 0, 1, 1], [], []>} : vector<24x32xbf16>, vector<32x512xbf16>, vector<24x512xf32> -> vector<24x512xf32>
    %c0_4 = arith.constant 0 : index
    %c0_5 = arith.constant 0 : index
    %4 = vector.load %arg3[%c0_4, %c0_5] : memref<24x1xf32, #tpu.memory_space<vmem>>, vector<24x1xf32>
    %5 = vector.broadcast %4 : vector<24x1xf32> to vector<24x512xf32>
    %6 = arith.addf %3, %5 : vector<24x512xf32>
    %cst_6 = arith.constant 0.000000e+00 : f32
    %7 = vector.broadcast %cst_6 : f32 to vector<24x512xf32>
    %8 = arith.maximumf %6, %7 : vector<24x512xf32>
    %9 = vector.extract_strided_slice %8 {offsets = [0, 0], sizes = [8, 512], strides = [1, 1]} : vector<24x512xf32> to vector<8x512xf32>
    %c17_i32 = arith.constant 17 : i32
    %10 = tpu.dynamic_rotate %9 by %c17_i32 dim 1 : vector<8x512xf32>, i32 -> vector<8x512xf32>
    %c0_7 = arith.constant 0 : index
    %c0_8 = arith.constant 0 : index
    %c0_9 = arith.constant 0 : index
    %11 = vector.load %arg8[%c0_7, %c0_8, %c0_9] : memref<27x8x512xf32, #tpu.memory_space<vmem>>, vector<1x8x512xf32>
    %12 = vector.shape_cast %11 : vector<1x8x512xf32> to vector<8x512xf32>
    %13 = arith.mulf %10, %12 : vector<8x512xf32>
    %c16_i32 = arith.constant 16 : i32
    %14 = tpu.dynamic_rotate %9 by %c16_i32 dim 1 : vector<8x512xf32>, i32 -> vector<8x512xf32>
    %c1 = arith.constant 1 : index
    %c0_10 = arith.constant 0 : index
    %c0_11 = arith.constant 0 : index
    %15 = vector.load %arg8[%c1, %c0_10, %c0_11] : memref<27x8x512xf32, #tpu.memory_space<vmem>>, vector<1x8x512xf32>
    %16 = vector.shape_cast %15 : vector<1x8x512xf32> to vector<8x512xf32>
    %17 = arith.mulf %14, %16 : vector<8x512xf32>
    %c15_i32 = arith.constant 15 : i32
    %18 = tpu.dynamic_rotate %9 by %c15_i32 dim 1 : vector<8x512xf32>, i32 -> vector<8x512xf32>
    %c2 = arith.constant 2 : index
    %c0_12 = arith.constant 0 : index
    %c0_13 = arith.constant 0 : index
    %19 = vector.load %arg8[%c2, %c0_12, %c0_13] : memref<27x8x512xf32, #tpu.memory_space<vmem>>, vector<1x8x512xf32>
    %20 = vector.shape_cast %19 : vector<1x8x512xf32> to vector<8x512xf32>
    %21 = arith.mulf %18, %20 : vector<8x512xf32>
    %c1_i32 = arith.constant 1 : i32
    %22 = tpu.dynamic_rotate %9 by %c1_i32 dim 1 : vector<8x512xf32>, i32 -> vector<8x512xf32>
    %c3 = arith.constant 3 : index
    %c0_14 = arith.constant 0 : index
    %c0_15 = arith.constant 0 : index
    %23 = vector.load %arg8[%c3, %c0_14, %c0_15] : memref<27x8x512xf32, #tpu.memory_space<vmem>>, vector<1x8x512xf32>
    %24 = vector.shape_cast %23 : vector<1x8x512xf32> to vector<8x512xf32>
    %25 = arith.mulf %22, %24 : vector<8x512xf32>
    %c511_i32 = arith.constant 511 : i32
    %26 = tpu.dynamic_rotate %9 by %c511_i32 dim 1 : vector<8x512xf32>, i32 -> vector<8x512xf32>
    %c5 = arith.constant 5 : index
    %c0_16 = arith.constant 0 : index
    %c0_17 = arith.constant 0 : index
    %27 = vector.load %arg8[%c5, %c0_16, %c0_17] : memref<27x8x512xf32, #tpu.memory_space<vmem>>, vector<1x8x512xf32>
    %28 = vector.shape_cast %27 : vector<1x8x512xf32> to vector<8x512xf32>
    %29 = arith.mulf %26, %28 : vector<8x512xf32>
    %c497_i32 = arith.constant 497 : i32
    %30 = tpu.dynamic_rotate %9 by %c497_i32 dim 1 : vector<8x512xf32>, i32 -> vector<8x512xf32>
    %c6 = arith.constant 6 : index
    %c0_18 = arith.constant 0 : index
    %c0_19 = arith.constant 0 : index
    %31 = vector.load %arg8[%c6, %c0_18, %c0_19] : memref<27x8x512xf32, #tpu.memory_space<vmem>>, vector<1x8x512xf32>
    %32 = vector.shape_cast %31 : vector<1x8x512xf32> to vector<8x512xf32>
    %33 = arith.mulf %30, %32 : vector<8x512xf32>
    %c496_i32 = arith.constant 496 : i32
    %34 = tpu.dynamic_rotate %9 by %c496_i32 dim 1 : vector<8x512xf32>, i32 -> vector<8x512xf32>
    %c7 = arith.constant 7 : index
    %c0_20 = arith.constant 0 : index
    %c0_21 = arith.constant 0 : index
    %35 = vector.load %arg8[%c7, %c0_20, %c0_21] : memref<27x8x512xf32, #tpu.memory_space<vmem>>, vector<1x8x512xf32>
    %36 = vector.shape_cast %35 : vector<1x8x512xf32> to vector<8x512xf32>
    %37 = arith.mulf %34, %36 : vector<8x512xf32>
    %c495_i32 = arith.constant 495 : i32
    %38 = tpu.dynamic_rotate %9 by %c495_i32 dim 1 : vector<8x512xf32>, i32 -> vector<8x512xf32>
    %c8 = arith.constant 8 : index
    %c0_22 = arith.constant 0 : index
    %c0_23 = arith.constant 0 : index
    %39 = vector.load %arg8[%c8, %c0_22, %c0_23] : memref<27x8x512xf32, #tpu.memory_space<vmem>>, vector<1x8x512xf32>
    %40 = vector.shape_cast %39 : vector<1x8x512xf32> to vector<8x512xf32>
    %41 = arith.mulf %38, %40 : vector<8x512xf32>
    %42 = vector.extract_strided_slice %8 {offsets = [8, 0], sizes = [8, 512], strides = [1, 1]} : vector<24x512xf32> to vector<8x512xf32>
    %c34_i32 = arith.constant 34 : i32
    %43 = tpu.dynamic_rotate %42 by %c34_i32 dim 1 : vector<8x512xf32>, i32 -> vector<8x512xf32>
    %c9 = arith.constant 9 : index
    %c0_24 = arith.constant 0 : index
    %c0_25 = arith.constant 0 : index
    %44 = vector.load %arg8[%c9, %c0_24, %c0_25] : memref<27x8x512xf32, #tpu.memory_space<vmem>>, vector<1x8x512xf32>
    %45 = vector.shape_cast %44 : vector<1x8x512xf32> to vector<8x512xf32>
    %46 = arith.mulf %43, %45 : vector<8x512xf32>
    %c32_i32 = arith.constant 32 : i32
    %47 = tpu.dynamic_rotate %42 by %c32_i32 dim 1 : vector<8x512xf32>, i32 -> vector<8x512xf32>
    %c10 = arith.constant 10 : index
    %c0_26 = arith.constant 0 : index
    %c0_27 = arith.constant 0 : index
    %48 = vector.load %arg8[%c10, %c0_26, %c0_27] : memref<27x8x512xf32, #tpu.memory_space<vmem>>, vector<1x8x512xf32>
    %49 = vector.shape_cast %48 : vector<1x8x512xf32> to vector<8x512xf32>
    %50 = arith.mulf %47, %49 : vector<8x512xf32>
    %c30_i32 = arith.constant 30 : i32
    %51 = tpu.dynamic_rotate %42 by %c30_i32 dim 1 : vector<8x512xf32>, i32 -> vector<8x512xf32>
    %c11 = arith.constant 11 : index
    %c0_28 = arith.constant 0 : index
    %c0_29 = arith.constant 0 : index
    %52 = vector.load %arg8[%c11, %c0_28, %c0_29] : memref<27x8x512xf32, #tpu.memory_space<vmem>>, vector<1x8x512xf32>
    %53 = vector.shape_cast %52 : vector<1x8x512xf32> to vector<8x512xf32>
    %54 = arith.mulf %51, %53 : vector<8x512xf32>
    %c2_i32 = arith.constant 2 : i32
    %55 = tpu.dynamic_rotate %42 by %c2_i32 dim 1 : vector<8x512xf32>, i32 -> vector<8x512xf32>
    %c12 = arith.constant 12 : index
    %c0_30 = arith.constant 0 : index
    %c0_31 = arith.constant 0 : index
    %56 = vector.load %arg8[%c12, %c0_30, %c0_31] : memref<27x8x512xf32, #tpu.memory_space<vmem>>, vector<1x8x512xf32>
    %57 = vector.shape_cast %56 : vector<1x8x512xf32> to vector<8x512xf32>
    %58 = arith.mulf %55, %57 : vector<8x512xf32>
    %c510_i32 = arith.constant 510 : i32
    %59 = tpu.dynamic_rotate %42 by %c510_i32 dim 1 : vector<8x512xf32>, i32 -> vector<8x512xf32>
    %c14 = arith.constant 14 : index
    %c0_32 = arith.constant 0 : index
    %c0_33 = arith.constant 0 : index
    %60 = vector.load %arg8[%c14, %c0_32, %c0_33] : memref<27x8x512xf32, #tpu.memory_space<vmem>>, vector<1x8x512xf32>
    %61 = vector.shape_cast %60 : vector<1x8x512xf32> to vector<8x512xf32>
    %62 = arith.mulf %59, %61 : vector<8x512xf32>
    %c482_i32 = arith.constant 482 : i32
    %63 = tpu.dynamic_rotate %42 by %c482_i32 dim 1 : vector<8x512xf32>, i32 -> vector<8x512xf32>
    %c15 = arith.constant 15 : index
    %c0_34 = arith.constant 0 : index
    %c0_35 = arith.constant 0 : index
    %64 = vector.load %arg8[%c15, %c0_34, %c0_35] : memref<27x8x512xf32, #tpu.memory_space<vmem>>, vector<1x8x512xf32>
    %65 = vector.shape_cast %64 : vector<1x8x512xf32> to vector<8x512xf32>
    %66 = arith.mulf %63, %65 : vector<8x512xf32>
    %c480_i32 = arith.constant 480 : i32
    %67 = tpu.dynamic_rotate %42 by %c480_i32 dim 1 : vector<8x512xf32>, i32 -> vector<8x512xf32>
    %c16 = arith.constant 16 : index
    %c0_36 = arith.constant 0 : index
    %c0_37 = arith.constant 0 : index
    %68 = vector.load %arg8[%c16, %c0_36, %c0_37] : memref<27x8x512xf32, #tpu.memory_space<vmem>>, vector<1x8x512xf32>
    %69 = vector.shape_cast %68 : vector<1x8x512xf32> to vector<8x512xf32>
    %70 = arith.mulf %67, %69 : vector<8x512xf32>
    %c478_i32 = arith.constant 478 : i32
    %71 = tpu.dynamic_rotate %42 by %c478_i32 dim 1 : vector<8x512xf32>, i32 -> vector<8x512xf32>
    %c17 = arith.constant 17 : index
    %c0_38 = arith.constant 0 : index
    %c0_39 = arith.constant 0 : index
    %72 = vector.load %arg8[%c17, %c0_38, %c0_39] : memref<27x8x512xf32, #tpu.memory_space<vmem>>, vector<1x8x512xf32>
    %73 = vector.shape_cast %72 : vector<1x8x512xf32> to vector<8x512xf32>
    %74 = arith.mulf %71, %73 : vector<8x512xf32>
    %75 = vector.extract_strided_slice %8 {offsets = [16, 0], sizes = [8, 512], strides = [1, 1]} : vector<24x512xf32> to vector<8x512xf32>
    %c68_i32 = arith.constant 68 : i32
    %76 = tpu.dynamic_rotate %75 by %c68_i32 dim 1 : vector<8x512xf32>, i32 -> vector<8x512xf32>
    %c18 = arith.constant 18 : index
    %c0_40 = arith.constant 0 : index
    %c0_41 = arith.constant 0 : index
    %77 = vector.load %arg8[%c18, %c0_40, %c0_41] : memref<27x8x512xf32, #tpu.memory_space<vmem>>, vector<1x8x512xf32>
    %78 = vector.shape_cast %77 : vector<1x8x512xf32> to vector<8x512xf32>
    %79 = arith.mulf %76, %78 : vector<8x512xf32>
    %c64_i32 = arith.constant 64 : i32
    %80 = tpu.dynamic_rotate %75 by %c64_i32 dim 1 : vector<8x512xf32>, i32 -> vector<8x512xf32>
    %c19 = arith.constant 19 : index
    %c0_42 = arith.constant 0 : index
    %c0_43 = arith.constant 0 : index
    %81 = vector.load %arg8[%c19, %c0_42, %c0_43] : memref<27x8x512xf32, #tpu.memory_space<vmem>>, vector<1x8x512xf32>
    %82 = vector.shape_cast %81 : vector<1x8x512xf32> to vector<8x512xf32>
    %83 = arith.mulf %80, %82 : vector<8x512xf32>
    %c60_i32 = arith.constant 60 : i32
    %84 = tpu.dynamic_rotate %75 by %c60_i32 dim 1 : vector<8x512xf32>, i32 -> vector<8x512xf32>
    %c20 = arith.constant 20 : index
    %c0_44 = arith.constant 0 : index
    %c0_45 = arith.constant 0 : index
    %85 = vector.load %arg8[%c20, %c0_44, %c0_45] : memref<27x8x512xf32, #tpu.memory_space<vmem>>, vector<1x8x512xf32>
    %86 = vector.shape_cast %85 : vector<1x8x512xf32> to vector<8x512xf32>
    %87 = arith.mulf %84, %86 : vector<8x512xf32>
    %c4_i32 = arith.constant 4 : i32
    %88 = tpu.dynamic_rotate %75 by %c4_i32 dim 1 : vector<8x512xf32>, i32 -> vector<8x512xf32>
    %c21 = arith.constant 21 : index
    %c0_46 = arith.constant 0 : index
    %c0_47 = arith.constant 0 : index
    %89 = vector.load %arg8[%c21, %c0_46, %c0_47] : memref<27x8x512xf32, #tpu.memory_space<vmem>>, vector<1x8x512xf32>
    %90 = vector.shape_cast %89 : vector<1x8x512xf32> to vector<8x512xf32>
    %91 = arith.mulf %88, %90 : vector<8x512xf32>
    %c508_i32 = arith.constant 508 : i32
    %92 = tpu.dynamic_rotate %75 by %c508_i32 dim 1 : vector<8x512xf32>, i32 -> vector<8x512xf32>
    %c23 = arith.constant 23 : index
    %c0_48 = arith.constant 0 : index
    %c0_49 = arith.constant 0 : index
    %93 = vector.load %arg8[%c23, %c0_48, %c0_49] : memref<27x8x512xf32, #tpu.memory_space<vmem>>, vector<1x8x512xf32>
    %94 = vector.shape_cast %93 : vector<1x8x512xf32> to vector<8x512xf32>
    %95 = arith.mulf %92, %94 : vector<8x512xf32>
    %c452_i32 = arith.constant 452 : i32
    %96 = tpu.dynamic_rotate %75 by %c452_i32 dim 1 : vector<8x512xf32>, i32 -> vector<8x512xf32>
    %c24 = arith.constant 24 : index
    %c0_50 = arith.constant 0 : index
    %c0_51 = arith.constant 0 : index
    %97 = vector.load %arg8[%c24, %c0_50, %c0_51] : memref<27x8x512xf32, #tpu.memory_space<vmem>>, vector<1x8x512xf32>
    %98 = vector.shape_cast %97 : vector<1x8x512xf32> to vector<8x512xf32>
    %99 = arith.mulf %96, %98 : vector<8x512xf32>
    %c448_i32 = arith.constant 448 : i32
    %100 = tpu.dynamic_rotate %75 by %c448_i32 dim 1 : vector<8x512xf32>, i32 -> vector<8x512xf32>
    %c25 = arith.constant 25 : index
    %c0_52 = arith.constant 0 : index
    %c0_53 = arith.constant 0 : index
    %101 = vector.load %arg8[%c25, %c0_52, %c0_53] : memref<27x8x512xf32, #tpu.memory_space<vmem>>, vector<1x8x512xf32>
    %102 = vector.shape_cast %101 : vector<1x8x512xf32> to vector<8x512xf32>
    %103 = arith.mulf %100, %102 : vector<8x512xf32>
    %c444_i32 = arith.constant 444 : i32
    %104 = tpu.dynamic_rotate %75 by %c444_i32 dim 1 : vector<8x512xf32>, i32 -> vector<8x512xf32>
    %c26 = arith.constant 26 : index
    %c0_54 = arith.constant 0 : index
    %c0_55 = arith.constant 0 : index
    %105 = vector.load %arg8[%c26, %c0_54, %c0_55] : memref<27x8x512xf32, #tpu.memory_space<vmem>>, vector<1x8x512xf32>
    %106 = vector.shape_cast %105 : vector<1x8x512xf32> to vector<8x512xf32>
    %107 = arith.mulf %104, %106 : vector<8x512xf32>
    %108 = tpu.concatenate %13, %17, %21, %25, %9, %29, %33, %37, %41, %46, %50, %54, %58, %42, %62, %66 in 0 : vector<8x512xf32>, vector<8x512xf32>, vector<8x512xf32>, vector<8x512xf32>, vector<8x512xf32>, vector<8x512xf32>, vector<8x512xf32>, vector<8x512xf32>, vector<8x512xf32>, vector<8x512xf32>, vector<8x512xf32>, vector<8x512xf32>, vector<8x512xf32>, vector<8x512xf32>, vector<8x512xf32>, vector<8x512xf32> -> vector<128x512xf32>
    %109 = tpu.concatenate %70, %74, %79, %83, %87, %91, %75, %95, %99, %103, %107 in 0 : vector<8x512xf32>, vector<8x512xf32>, vector<8x512xf32>, vector<8x512xf32>, vector<8x512xf32>, vector<8x512xf32>, vector<8x512xf32>, vector<8x512xf32>, vector<8x512xf32>, vector<8x512xf32>, vector<8x512xf32> -> vector<88x512xf32>
    %110 = tpu.concatenate %108, %109 in 0 : vector<128x512xf32>, vector<88x512xf32> -> vector<216x512xf32>
    %111 = arith.truncf %110 : vector<216x512xf32> to vector<216x512xbf16>
    %c0_56 = arith.constant 0 : index
    %c0_57 = arith.constant 0 : index
    %112 = vector.load %arg4[%c0_56, %c0_57] : memref<24x216xbf16, #tpu.memory_space<vmem>>, vector<24x216xbf16>
    %cst_58 = arith.constant dense<0.000000e+00> : vector<24x512xf32>
    %113 = tpu.matmul %112, %111, %cst_58 {dimension_numbers = #tpu.dot_dimension_numbers<[1], [0], [0], [1], [0, 0, 1, 1], [], []>} : vector<24x216xbf16>, vector<216x512xbf16>, vector<24x512xf32> -> vector<24x512xf32>
    %c0_59 = arith.constant 0 : index
    %c0_60 = arith.constant 0 : index
    %114 = vector.load %arg5[%c0_59, %c0_60] : memref<24x1xf32, #tpu.memory_space<vmem>>, vector<24x1xf32>
    %115 = vector.broadcast %114 : vector<24x1xf32> to vector<24x512xf32>
    %116 = arith.addf %113, %115 : vector<24x512xf32>
    %cst_61 = arith.constant 0.000000e+00 : f32
    %117 = vector.broadcast %cst_61 : f32 to vector<24x512xf32>
    %118 = arith.maximumf %116, %117 : vector<24x512xf32>
    %c0_62 = arith.constant 0 : index
    %c0_63 = arith.constant 0 : index
    %119 = vector.load %arg6[%c0_62, %c0_63] : memref<32x24xbf16, #tpu.memory_space<vmem>>, vector<32x24xbf16>
    %120 = arith.truncf %118 : vector<24x512xf32> to vector<24x512xbf16>
    %cst_64 = arith.constant dense<0.000000e+00> : vector<32x512xf32>
    %121 = tpu.matmul %119, %120, %cst_64 {dimension_numbers = #tpu.dot_dimension_numbers<[1], [0], [0], [1], [0, 0, 1, 1], [], []>} : vector<32x24xbf16>, vector<24x512xbf16>, vector<32x512xf32> -> vector<32x512xf32>
    %c0_65 = arith.constant 0 : index
    %c0_66 = arith.constant 0 : index
    %122 = vector.load %arg7[%c0_65, %c0_66] : memref<32x1xf32, #tpu.memory_space<vmem>>, vector<32x1xf32>
    %123 = vector.broadcast %122 : vector<32x1xf32> to vector<32x512xf32>
    %124 = arith.addf %121, %123 : vector<32x512xf32>
    %c0_67 = arith.constant 0 : index
    %c0_68 = arith.constant 0 : index
    %c0_69 = arith.constant 0 : index
    %125 = vector.load %arg9[%c0_67, %c0_68, %c0_69] : memref<1x32x512xf32, #tpu.memory_space<vmem>>, vector<1x32x512xf32>
    %126 = vector.shape_cast %125 : vector<1x32x512xf32> to vector<32x512xf32>
    %127 = vector.shape_cast %124 : vector<32x512xf32> to vector<1x32x512xf32>
    tpu.vector_store %arg9[%c0_67, %c0_68, %c0_69], %127 {strides = array<i32>} : memref<1x32x512xf32, #tpu.memory_space<vmem>>, vector<1x32x512xf32>,
    return
  }
  func.func @transform_0(%arg0: i32) -> (i32, i32, i32) {
    %c0_i32 = arith.constant 0 : i32
    %c0_i32_0 = arith.constant 0 : i32
    %c0_i32_1 = arith.constant 0 : i32
    return %arg0, %c0_i32, %c0_i32_0 : i32, i32, i32
  }
  func.func @transform_1(%arg0: i32) -> (i32, i32) {
    %c0_i32 = arith.constant 0 : i32
    %c0_i32_0 = arith.constant 0 : i32
    %c0_i32_1 = arith.constant 0 : i32
    return %c0_i32, %c0_i32_0 : i32, i32
  }
  func.func @transform_2(%arg0: i32) -> (i32, i32) {
    %c0_i32 = arith.constant 0 : i32
    %c0_i32_0 = arith.constant 0 : i32
    %c0_i32_1 = arith.constant 0 : i32
    return %c0_i32, %c0_i32_0 : i32, i32
  }
  func.func @transform_3(%arg0: i32) -> (i32, i32) {
    %c0_i32 = arith.constant 0 : i32
    %c0_i32_0 = arith.constant 0 : i32
    %c0_i32_1 = arith.constant 0 : i32
    return %c0_i32, %c0_i32_0 : i32, i32
  }
  func.func @transform_4(%arg0: i32) -> (i32, i32) {
    %c0_i32 = arith.constant 0 : i32
    %c0_i32_0 = arith.constant 0 : i32
    %c0_i32_1 = arith.constant 0 : i32
    return %c0_i32, %c0_i32_0 : i32, i32
  }
  func.func @transform_5(%arg0: i32) -> (i32, i32) {
    %c0_i32 = arith.constant 0 : i32
    %c0_i32_0 = arith.constant 0 : i32
    %c0_i32_1 = arith.constant 0 : i32
    return %c0_i32, %c0_i32_0 : i32, i32
  }
  func.func @transform_6(%arg0: i32) -> (i32, i32) {
    %c0_i32 = arith.constant 0 : i32
    %c0_i32_0 = arith.constant 0 : i32
    %c0_i32_1 = arith.constant 0 : i32
    return %c0_i32, %c0_i32_0 : i32, i32
  }
  func.func @transform_7(%arg0: i32) -> (i32, i32, i32) {
    %c0_i32 = arith.constant 0 : i32
    %c0_i32_0 = arith.constant 0 : i32
    %c0_i32_1 = arith.constant 0 : i32
    %c0_i32_2 = arith.constant 0 : i32
    return %c0_i32, %c0_i32_0, %c0_i32_1 : i32, i32, i32
  }
  func.func @transform_8(%arg0: i32) -> (i32, i32, i32) {
    %c0_i32 = arith.constant 0 : i32
    %c0_i32_0 = arith.constant 0 : i32
    %c0_i32_1 = arith.constant 0 : i32
    return %arg0, %c0_i32, %c0_i32_0 : i32, i32, i32
  }
}

</mosaic_0001>

<bundles_post_ra>
// kernel: tpu_custom_call.1
= control target key start
LH: loop header
LB: loop body
LE: loop exit
PB: predicated region body
PF: predicated region fallthrough
CT: control target
= control target key end

     0   :  { %13 = vsyncpa [#allocation3], 0  ;;  %s2294_s0 = inlined_call_operand.hbm [shape: bf16[1,32,512], index: 0, kind: input, shape index: {}]   ;;  %s2295_s1 = inlined_call_operand.vmem [shape: bf16[24,32], index: 1, kind: input, shape index: {}]   ;;  %s2296_s2 = inlined_call_operand.vmem [shape: f32[24,1], index: 2, kind: input, shape index: {}]   ;;  %s2297_s3 = inlined_call_operand.vmem [shape: bf16[24,216], index: 3, kind: input, shape index: {}]   ;;  %s2298_s4 = inlined_call_operand.vmem [shape: f32[24,1], index: 4, kind: input, shape index: {}]   ;;  %s2299_s5 = inlined_call_operand.vmem [shape: bf16[32,24], index: 5, kind: input, shape index: {}]   ;;  %s2300_s6 = inlined_call_operand.vmem [shape: f32[32,1], index: 6, kind: input, shape index: {}]   ;;  %s2301_s7 = inlined_call_operand.hbm [shape: f32[27,8,512], index: 7, kind: input, shape index: {}]   ;;  %s2302_s8 = inlined_call_operand.hbm [shape: f32[1,32,512], index: 8, kind: output, shape index: {}]  }
   0x1   :  { %14 = vsyncpa [#allocation6], 0 }
   0x2   :  { %15 = vsyncpa [#allocation4], 0  ;;  %s20_s29 = sshll.u32 %s2294_s0, 4  ;;  %s1363_s30 = smov [#allocation2]   ;;  %s21_s29 = int_to_ptr.hbm [resolvable:$true] %s20_s29 }
   0x3   :  { %s22_s9 = sshll.u32 %s1363_s30, 4  ;;  %s45_s12 = sshll.u32 %s2301_s7, 4  ;;  %s23_s9 = int_to_ptr.vmem [resolvable:$true] %s22_s9  ;;  %s46_s12 = int_to_ptr.hbm [resolvable:$true] %s45_s12 }
   0x4   :  { %s1364_s13 = smov 256   ;;  %s1365_s14 = smov 16  }
   0x5   :  { %28 = dma.hbm_to_vmem [thread:$0]  %s21_s29, 1024, %s23_s9, [#allocation3], %s1364_s13, %s1364_s13, %s1365_s14  }
   0x6   :  { %s1366_s15 = smov [#allocation5]   ;;  %s1367_s17 = smov 512  }
   0x7   :  { %s47_s16 = sshll.u32 %s1366_s15, 4  ;;  %s1368_s18 = smov 32   ;;  %s48_s16 = int_to_ptr.vmem [resolvable:$true] %s47_s16 }
   0x8   :  { %53 = dma.hbm_to_vmem [thread:$0]  %s46_s12, 13824, %s48_s16, [#allocation6], %s1367_s17, %s1367_s17, %s1368_s18  }
   0x9   :  { %1357 = dma.done.wait [#allocation3], 1024  }
   0xa   :  { %1358 = vsyncadd [#allocation3], 4294966272 }
   0xb   :  { %1359 = dma.done.wait [#allocation6], 13824  }
   0xc   :  { %1360 = vsyncadd [#allocation6], 4294953472  ;;  %v1369_v0 = vmov 0   ;;  %v1188_v1 = vld [vmem:[#allocation2 + $0x20] sm:$0xf]  ;;  %v75_v27 = vld [vmem:[%s2296_s2 + $0x8] sm:$0xff] }
   0xd   :  { %1283 = vset.pattern.permute.xlu1 %v1369_v0  ;;  %1282 = vset.pattern.permute.xlu0 %v1369_v0  ;;  %v1248_v2 = vld [vmem:[#allocation2 + $0x2c] sm:$0xf0]  ;;  %v1246_v3 = vld [vmem:[#allocation2 + $0x24] sm:$0xf]  ;;  %v1190_v5 = vld [vmem:[#allocation2 + $0x30] sm:$0xf0] }
   0xe   :  { %1284 = vset.pattern.permute.xlu2 %v1369_v0  ;;  %v1189_v4 = vor.u32 %v1248_v2, %v1188_v1  ;;  %v1196_v6 = vld [vmem:[#allocation2 + $0x28] sm:$0xf]  ;;  %v1249_v7 = vld [vmem:[#allocation2 + $0x34] sm:$0xf0]  ;;  %v1193_v8 = vor.u32 %v1246_v3, %v1190_v5  ;;  %v1247_v10 = vld [vmem:[#allocation2 + $0x2c] sm:$0xf]  ;;  %84 = vperm.xlu0 %1282, %v75_v27  }
   0xf   :  { %v1197_v9 = vor.u32 %v1249_v7, %v1196_v6  ;;  %v1198_v11 = vld [vmem:[#allocation2 + $0x38] sm:$0xf0]  ;;  %v1172_v12 = vld [vmem:[#allocation2] sm:$0xf]  ;;  %v1244_v14 = vld [vmem:[#allocation2 + $0xc] sm:$0xf0] }
  0x10   :  { %153 = vmatpush.bf16.msra.mxu0 %v1189_v4  ;;  %v1201_v13 = vor.u32 %v1247_v10, %v1198_v11  ;;  %v1242_v15 = vld [vmem:[#allocation2 + $0x4] sm:$0xf]  ;;  %v1174_v16 = vld [vmem:[#allocation2 + $0x10] sm:$0xf0]  ;;  %171 = vmatpush.bf16.msra.mxu1 %v1193_v8  ;;  %v1173_v17 = vor.u32 %v1244_v14, %v1172_v12  ;;  %v1180_v19 = vld [vmem:[#allocation2 + $0x8] sm:$0xf] }
  0x11   :  { %189 = vmatpush.bf16.msra.mxu2 %v1197_v9  ;;  %v1177_v18 = vor.u32 %v1242_v15, %v1174_v16  ;;  %v1245_v20 = vld [vmem:[#allocation2 + $0x14] sm:$0xf0]  ;;  %v1243_v21 = vld [vmem:[#allocation2 + $0xc] sm:$0xf]  ;;  %v1182_v23 = vld [vmem:[#allocation2 + $0x18] sm:$0xf0] }
  0x12   :  { %207 = vmatpush.bf16.msra.mxu3 %v1201_v13  ;;  %v1181_v22 = vor.u32 %v1245_v20, %v1180_v19  ;;  %v74_v24 = vld [vmem:[%s2296_s2] sm:$0xff]  ;;  %v1185_v25 = vor.u32 %v1243_v21, %v1182_v23  ;;  %vm140_vm0 = vcmask 261120   ;;  %v76_v28 = vld [vmem:[%s2296_s2 + $0x10] sm:$0xff]  ;;  %v73_v29 = vld [vmem:[%s2295_s1 + $0x8] sm:$0xf]  ;;  %s1370_s2 = smov 112   ;;  %v239_v19 = vlaneseq }
  0x13   :  { %v1250_v26 = vld [vmem:[%s2295_s1] sm:$0xff]  ;;  %79 = vperm.xlu1 %1283, %v74_v24   ;;  %v97_v30 = vunpack.c.l.b16 %v73_v29  ;;  %s1371_s1 = smov 113   ;;  %s1372_s27 = smov 111  }
  0x14   :  { %154 = vmatpush.bf16.msra.mxu0 %v1173_v17  ;;  %172 = vmatpush.bf16.msra.mxu1 %v1177_v18  ;;  %s1373_s28 = smov 127   ;;  %s1374_s29 = smov 15   ;;  %v1631_v24 = vand.u32 127, %v239_v19 }
  0x15   :  { %190 = vmatpush.bf16.msra.mxu2 %v1181_v22  ;;  %v99_v31 = vpack.c.b16 %v97_v30, %v97_v30  ;;  %s1375_s30 = smov 1   ;;  %s1376_s9 = smov 17   ;;  %v313_v30 = vld [vmem:[#allocation5 + $0x68] sm:$0xff] }
  0x16   :  { %208 = vmatpush.bf16.msra.mxu3 %v1185_v25  ;;  %89 = vperm.xlu0 %1282, %v76_v28   ;;  %s1377_s10 = smov 126   ;;  %s1378_s11 = smov 2   ;;  %vm2313_vm1 = vcmp.lt.s32.totalorder %v1631_v24, 15  ;;  %vm2312_vm2 = vcmp.lt.s32.totalorder %v1631_v24, 1  ;;  %vm526_vm3 = vcmp.lt.s32.totalorder %v1631_v24, 98  ;;  %vm504_vm4 = vcmp.lt.s32.totalorder %v1631_v24, 126 }
  0x17   :  { %1202 = vmatmul.msk.bf16.vlgmr.msra.gmra.mxu0 %vm140_vm0, %v1250_v26  ;;  %1204 = vmatmul.msk.bf16.vlgmr.msra.gmra.mxu1 %vm140_vm0, %v1250_v26  ;;  %s1379_s12 = smov 98   ;;  %s1380_s13 = smov 30   ;;  %vm482_vm5 = vcmp.lt.s32.totalorder %v1631_v24, 2  ;;  %vm438_vm6 = vcmp.lt.s32.totalorder %v1631_v24, 32  ;;  %vm460_vm7 = vcmp.lt.s32.totalorder %v1631_v24, 30  ;;  %vm394_vm8 = vcmp.lt.s32.totalorder %v1631_v24, 111 }
  0x18   :  { %1206 = vmatmul.msk.bf16.vlgmr.msra.gmra.mxu2 %vm140_vm0, %v1250_v26  ;;  %s1381_s15 = smov 94   ;;  %s1382_s16 = smov 34   ;;  %vm416_vm9 = vcmp.lt.s32.totalorder %v1631_v24, 34  ;;  %vm372_vm10 = vcmp.lt.s32.totalorder %v1631_v24, 112  ;;  %vm350_vm11 = vcmp.lt.s32.totalorder %v1631_v24, 113  ;;  %vm2316_vm12 = vcmp.lt.s32.totalorder %v1631_v24, 127 }
  0x19   :  { %1208 = vmatmul.msk.bf16.vlgmr.msra.gmra.mxu3 %vm140_vm0, %v1250_v26  ;;  %s1383_s0 = smov 96   ;;  %s1384_s7 = smov 60   ;;  %v291_v26 = vld [vmem:[#allocation5 + $0x48] sm:$0xff]  ;;  %vm636_vm13 = vcmp.lt.s32.totalorder %v1631_v24, 60  ;;  %vm262_vm14 = vcmp.lt.s32.totalorder %v1631_v24, 16  ;;  %vm241_vm15 = vcmp.lt.s32.totalorder %v1631_v24, 17 }
  0x1a   :  { %s1385_s19 = smov 64   ;;  %s1386_s20 = smov 4  }
  0x1b   :  { %s1387_s21 = smov 68   ;;  %s1388_s22 = smov 124  }
  0x1c   :  { %s1152_s26 = sshll.u32 %s2302_s8, 4  ;;  %s1153_s26 = int_to_ptr.hbm [resolvable:$true] %s1152_s26 }
  0x27   :  { %1203 = vmatmul.msk.bf16.gmra.mxu0 %vm140_vm0, %v99_v31  ;;  %1205 = vmatmul.msk.bf16.gmra.mxu1 %vm140_vm0, %v99_v31 }
  0x28   :  { %1207 = vmatmul.msk.bf16.gmra.mxu2 %vm140_vm0, %v99_v31 }
  0x29   :  { %1209 = vmatmul.msk.bf16.gmra.mxu3 %vm140_vm0, %v99_v31  ;;  %vm820_vm0 = vcmask 1043456  }
  0x80   :  { %v85_v57 = vpop.permute.xlu0 %84 }
  0x85   :  { %v80_v32 = vpop.permute.xlu1 %79 }
  0x88   :  { %v90_v4 = vpop.permute.xlu0 %89 }
  0x94   :  { %v156_v33 = vpop.f32.mrf.mxu0  ;;  %v174_v34 = vpop.f32.mrf.mxu1 }
  0x95   :  { %v175_v35 = vadd.f32 %v174_v34, %v80_v32  ;;  %v157_v38 = vadd.f32 %v156_v33, %v80_v32 }
  0x97   :  { %v1468_v36 = vmax.f32 %v175_v35, 0.0  ;;  %v1476_v42 = vmax.f32 %v157_v38, 0.0 }
  0x99   :  { %366 = vrot.lane.b32.xlu1 %v1468_v36, %s1370_s2  ;;  %344 = vrot.lane.b32.xlu2 %v1468_v36, %s1371_s1 }
  0x9a   :  { %388 = vrot.lane.b32.xlu0 %v1468_v36, %s1372_s27 }
  0x9b   :  { %v192_v37 = vpop.f32.mrf.mxu2 }
  0x9c   :  { %v210_v39 = vpop.f32.mrf.mxu3  ;;  %v158_v40 = vpop.f32.mrf.mxu0  ;;  %v193_v52 = vadd.f32 %v192_v37, %v80_v32 }
  0x9d   :  { %v176_v41 = vpop.f32.mrf.mxu1  ;;  %v211_v55 = vadd.f32 %v210_v39, %v80_v32  ;;  %v159_v60 = vadd.f32 %v158_v40, %v85_v57 }
  0x9e   :  { %v1504_v54 = vmax.f32 %v193_v52, 0.0  ;;  %v177_v58 = vadd.f32 %v176_v41, %v85_v57 }
  0x9f   :  { %v1512_v56 = vmax.f32 %v211_v55, 0.0  ;;  %v1528_v61 = vmax.f32 %v159_v60, 0.0 }
  0xa0   :  { %2326 = vst [vmem:[#allocation11_spill] sm:$0xff] %v1504_v54  ;;  %v1520_v59 = vmax.f32 %v177_v58, 0.0 }
  0xa1   :  { %322 = vrot.lane.b32.xlu1 %v1468_v36, %s1373_s28  ;;  %342 = vrot.lane.b32.xlu2 %v1476_v42, %s1371_s1  ;;  %2327 = vst [vmem:[#allocation12_spill] sm:$0xff] %v1512_v56 }
  0xa2   :  { %386 = vrot.lane.b32.xlu0 %v1476_v42, %s1372_s27 }
  0xa3   :  { %v194_v43 = vpop.f32.mrf.mxu2 }
  0xa4   :  { %v212_v44 = vpop.f32.mrf.mxu3  ;;  %v1484_v45 = vpop.f32.mrf.mxu0  ;;  %v195_v1 = vadd.f32 %v194_v43, %v85_v57 }
  0xa5   :  { %v1486_v46 = vpop.f32.mrf.mxu1  ;;  %v213_v62 = vadd.f32 %v212_v44, %v85_v57  ;;  %v162_v5 = vadd.f32 %v1484_v45, %v90_v4 }
  0xa6   :  { %v1562_v2 = vmax.f32 %v195_v1, 0.0  ;;  %v180_v10 = vadd.f32 %v1486_v46, %v90_v4  ;;  %v532_v1 = vld [vmem:[#allocation5 + $0x1e0] sm:$0xff] }
  0xa7   :  { %v1552_v63 = vmax.f32 %v213_v62, 0.0  ;;  %v1579_v7 = vmax.f32 %v162_v5, 0.0 }
  0xa8   :  { %v1594_v12 = vmax.f32 %v180_v10, 0.0  ;;  %v510_v10 = vld [vmem:[#allocation5 + $0x1c0] sm:$0xff] }
  0xa9   :  { %278 = vrot.lane.b32.xlu1 %v1468_v36, %s1374_s29  ;;  %298 = vrot.lane.b32.xlu2 %v1476_v42, %s1375_s30 }
  0xaa   :  { %364 = vrot.lane.b32.xlu0 %v1476_v42, %s1370_s2 }
  0xab   :  { %v1494_v47 = vpop.f32.mrf.mxu2 }
  0xac   :  { %v1496_v48 = vpop.f32.mrf.mxu3  ;;  %v163_v49 = vpop.f32.mrf.mxu0  ;;  %v198_v20 = vadd.f32 %v1494_v47, %v90_v4 }
  0xad   :  { %v181_v50 = vpop.f32.mrf.mxu1  ;;  %v216_v37 = vadd.f32 %v1496_v48, %v90_v4  ;;  %v312_v49 = vld [vmem:[#allocation5 + $0x60] sm:$0xff] }
  0xae   :  { %v1633_v25 = vmax.f32 %v198_v20, 0.0 }
  0xaf   :  { %v1675_v41 = vmax.f32 %v216_v37, 0.0 }
  0xb0   :  { %2332 = vst [vmem:[#allocation17_spill] sm:$0xff] %v1633_v25 }
  0xb1   :  { %233 = vrot.lane.b32.xlu1 %v1468_v36, %s1376_s9  ;;  %320 = vrot.lane.b32.xlu2 %v1476_v42, %s1373_s28  ;;  %2335 = vst [vmem:[#allocation20_spill] sm:$0xff] %v1675_v41 }
  0xb2   :  { %276 = vrot.lane.b32.xlu0 %v1476_v42, %s1374_s29 }
  0xb3   :  { %v199_v51 = vpop.f32.mrf.mxu2 }
  0xb4   :  { %v217_v53 = vpop.f32.mrf.mxu3 }
  0xb5   :  { %v290_v53 = vld [vmem:[#allocation5 + $0x40] sm:$0xff] }
  0xb9   :  { %390 = vrot.lane.b32.xlu1 %v1504_v54, %s1372_s27  ;;  %254 = vrot.lane.b32.xlu2 %v1476_v42, %s1365_s14 }
  0xba   :  { %300 = vrot.lane.b32.xlu0 %v1468_v36, %s1375_s30 }
  0xc1   :  { %304 = vrot.lane.b32.xlu1 %v1512_v56, %s1375_s30  ;;  %368 = vrot.lane.b32.xlu2 %v1504_v54, %s1370_s2 }
  0xc2   :  { %231 = vrot.lane.b32.xlu0 %v1476_v42, %s1376_s9 }
  0xc9   :  { %498 = vrot.lane.b32.xlu1 %v1520_v59, %s1377_s10  ;;  %324 = vrot.lane.b32.xlu2 %v1504_v54, %s1373_s28 }
  0xca   :  { %256 = vrot.lane.b32.xlu0 %v1468_v36, %s1365_s14 }
  0xd1   :  { %474 = vrot.lane.b32.xlu1 %v1528_v61, %s1378_s11  ;;  %520 = vrot.lane.b32.xlu2 %v1520_v59, %s1379_s12 }
  0xd2   :  { %346 = vrot.lane.b32.xlu0 %v1504_v54, %s1371_s1 }
  0xd9   :  { %518 = vrot.lane.b32.xlu1 %v1528_v61, %s1379_s12  ;;  %476 = vrot.lane.b32.xlu2 %v1520_v59, %s1378_s11 }
  0xda   :  { %282 = vrot.lane.b32.xlu0 %v1512_v56, %s1374_s29 }
  0xe1   :  { %452 = vrot.lane.b32.xlu1 %v1528_v61, %s1380_s13  ;;  %430 = vrot.lane.b32.xlu2 %v1528_v61, %s1368_s18 }
  0xe2   :  { %496 = vrot.lane.b32.xlu0 %v1528_v61, %s1377_s10 }
  0xe9   :  { %564 = vrot.lane.b32.xlu1 %v1520_v59, %s1381_s15  ;;  %454 = vrot.lane.b32.xlu2 %v1520_v59, %s1380_s13 }
  0xea   :  { %432 = vrot.lane.b32.xlu0 %v1520_v59, %s1368_s18 }
  0xf1   :  { %436 = vrot.lane.b32.xlu1 %v1552_v63, %s1368_s18  ;;  %408 = vrot.lane.b32.xlu2 %v1528_v61, %s1382_s16 }
  0xf2   :  { %410 = vrot.lane.b32.xlu0 %v1520_v59, %s1382_s16 }
  0xf3   :  { %v1560_v0 = vpop.permute.xlu2 %344 }
  0xf9   :  { %414 = vrot.lane.b32.xlu1 %v1552_v63, %s1382_s16  ;;  %542 = vrot.lane.b32.xlu2 %v1520_v59, %s1383_s0 }
  0xfa   :  { %522 = vrot.lane.b32.xlu0 %v1562_v2, %s1379_s12 }
  0xfb   :  { %v1569_v3 = vpop.permute.xlu2 %342 }
 0x101   :  { %524 = vrot.lane.b32.xlu1 %v1552_v63, %s1379_s12  ;;  %500 = vrot.lane.b32.xlu2 %v1562_v2, %s1377_s10 }
 0x102   :  { %544 = vrot.lane.b32.xlu0 %v1562_v2, %s1383_s0 }
 0x103   :  { %v1577_v6 = vpop.permute.xlu2 %298 }
 0x109   :  { %628 = vrot.lane.b32.xlu1 %v1579_v7, %s1384_s7  ;;  %480 = vrot.lane.b32.xlu2 %v1552_v63, %s1378_s11 }
 0x10a   :  { %502 = vrot.lane.b32.xlu0 %v1552_v63, %s1377_s10 }
 0x10b   :  { %v1587_v8 = vpop.permute.xlu1 %366  ;;  %v1589_v9 = vpop.permute.xlu2 %320 }
 0x10c   :  { %2328 = vst [vmem:[#allocation13_spill] sm:$0xff] %v1589_v9  ;;  %v1592_v11 = vpop.permute.xlu0 %388 }
 0x111   :  { %606 = vrot.lane.b32.xlu1 %v1579_v7, %s1385_s19  ;;  %458 = vrot.lane.b32.xlu2 %v1552_v63, %s1380_s13 }
 0x112   :  { %630 = vrot.lane.b32.xlu0 %v1594_v12, %s1384_s7 }
 0x113   :  { %v1602_v13 = vpop.permute.xlu1 %322  ;;  %v1604_v14 = vpop.permute.xlu2 %254 }
 0x114   :  { %v1606_v15 = vpop.permute.xlu0 %386 }
 0x119   :  { %650 = vrot.lane.b32.xlu1 %v1579_v7, %s1386_s20  ;;  %566 = vrot.lane.b32.xlu2 %v1562_v2, %s1381_s15 }
 0x11a   :  { %586 = vrot.lane.b32.xlu0 %v1594_v12, %s1387_s21 }
 0x11b   :  { %v1614_v16 = vpop.permute.xlu1 %278  ;;  %v1616_v17 = vpop.permute.xlu2 %368 }
 0x11c   :  { %2329 = vst [vmem:[#allocation14_spill] sm:$0xff] %v1614_v16  ;;  %v1618_v18 = vpop.permute.xlu0 %364 }
 0x121   :  { %672 = vrot.lane.b32.xlu1 %v1579_v7, %s1388_s22  ;;  %608 = vrot.lane.b32.xlu2 %v1594_v12, %s1385_s19 }
 0x122   :  { %584 = vrot.lane.b32.xlu0 %v1579_v7, %s1387_s21 }
 0x123   :  { %v1627_v21 = vpop.permute.xlu1 %233  ;;  %v1629_v22 = vpop.permute.xlu2 %324 }
 0x124   :  { %2330 = vst [vmem:[#allocation15_spill] sm:$0xff] %v1627_v21  ;;  %v277_v23 = vpop.permute.xlu0 %276 }
 0x125   :  { %2331 = vst [vmem:[#allocation16_spill] sm:$0xff] %v1629_v22  ;;  %v287_v27 = vsel %vm2313_vm1, %v277_v23, %v1614_v16 }
 0x126   :  { %v1656_v33 = vmul.f32 %v291_v26, %v287_v27 }
 0x129   :  { %632 = vrot.lane.b32.xlu1 %v1633_v25, %s1384_s7  ;;  %674 = vrot.lane.b32.xlu2 %v1594_v12, %s1388_s22 }
 0x12a   :  { %610 = vrot.lane.b32.xlu0 %v1633_v25, %s1385_s19 }
 0x12b   :  { %v1646_v28 = vpop.permute.xlu1 %390  ;;  %v1648_v29 = vpop.permute.xlu2 %520 }
 0x12c   :  { %v1650_v31 = vpop.permute.xlu0 %300 }
 0x12d   :  { %2333 = vst [vmem:[#allocation18_spill] sm:$0xff] %v1650_v31  ;;  %v309_v32 = vsel %vm2312_vm2, %v1577_v6, %v1650_v31  ;;  %v422_v31 = vld [vmem:[#allocation5 + $0x120] sm:$0xff] }
 0x12e   :  { %v1658_v34 = vmul.f32 %v313_v30, %v309_v32 }
 0x131   :  { %588 = vrot.lane.b32.xlu1 %v1633_v25, %s1387_s21  ;;  %652 = vrot.lane.b32.xlu2 %v1594_v12, %s1386_s20 }
 0x132   :  { %676 = vrot.lane.b32.xlu0 %v1633_v25, %s1388_s22 }
 0x133   :  { %v1669_v38 = vpop.permute.xlu1 %304  ;;  %v1671_v39 = vpop.permute.xlu2 %476 }
 0x134   :  { %2334 = vst [vmem:[#allocation19_spill] sm:$0xff] %v1669_v38  ;;  %v1673_v40 = vpop.permute.xlu0 %231  ;;  %v310_v50 = vsel %vm2312_vm2, %v1669_v38, %v1577_v6  ;;  %vm592_vm2 = vcmp.lt.s32.totalorder %v1631_v24, 68 }
 0x135   :  { %v1720_v58 = vmul.f32 %v312_v49, %v310_v50  ;;  %v488_v49 = vld [vmem:[#allocation5 + $0x180] sm:$0xff] }
 0x139   :  { %634 = vrot.lane.b32.xlu1 %v1675_v41, %s1384_s7  ;;  %656 = vrot.lane.b32.xlu2 %v1675_v41, %s1386_s20 }
 0x13a   :  { %612 = vrot.lane.b32.xlu0 %v1675_v41, %s1385_s19 }
 0x13b   :  { %v1683_v43 = vpop.permute.xlu1 %498  ;;  %v1685_v44 = vpop.permute.xlu2 %430 }
 0x13c   :  { %v1687_v45 = vpop.permute.xlu0 %256 }
 0x13d   :  { %2336 = vst [vmem:[#allocation21_spill] sm:$0xff] %v1687_v45 }
 0x141   :  { %237 = vrot.lane.b32.xlu1 %v1512_v56, %s1376_s9  ;;  %590 = vrot.lane.b32.xlu2 %v1675_v41, %s1387_s21 }
 0x142   :  { %478 = vrot.lane.b32.xlu0 %v1562_v2, %s1378_s11 }
 0x143   :  { %v1695_v46 = vpop.permute.xlu1 %474  ;;  %v1697_v47 = vpop.permute.xlu2 %454 }
 0x144   :  { %v1699_v48 = vpop.permute.xlu0 %346 }
 0x149   :  { %540 = vrot.lane.b32.xlu1 %v1528_v61, %s1383_s0  ;;  %260 = vrot.lane.b32.xlu2 %v1512_v56, %s1365_s14 }
 0x14a   :  { %434 = vrot.lane.b32.xlu0 %v1562_v2, %s1368_s18 }
 0x14b   :  { %v1711_v51 = vpop.permute.xlu1 %518  ;;  %v1713_v52 = vpop.permute.xlu2 %408 }
 0x14c   :  { %v1715_v55 = vpop.permute.xlu0 %282  ;;  %v529_v4 = vsel %vm526_vm3, %v1711_v51, %v1648_v29 }
 0x14d   :  { %2337 = vst [vmem:[#allocation22_spill] sm:$0xff] %v1715_v55  ;;  %v288_v57 = vsel %vm2313_vm1, %v1715_v55, %v277_v23  ;;  %v536_v23 = vmul.f32 %v532_v1, %v529_v4  ;;  %v489_v55 = vld [vmem:[#allocation5 + $0x188] sm:$0xff]  ;;  %vm658_vm1 = vcmp.lt.s32.totalorder %v1631_v24, 4 }
 0x14e   :  { %v1722_v60 = vmul.f32 %v290_v53, %v288_v57 }
 0x151   :  { %456 = vrot.lane.b32.xlu1 %v1562_v2, %s1380_s13  ;;  %562 = vrot.lane.b32.xlu2 %v1528_v61, %s1381_s15 }
 0x152   :  { %412 = vrot.lane.b32.xlu0 %v1562_v2, %s1382_s16 }
 0x153   :  { %v1738_v5 = vpop.permute.xlu1 %452  ;;  %v1740_v6 = vpop.permute.xlu2 %542 }
 0x154   :  { %v1742_v19 = vpop.permute.xlu0 %496 }
 0x155   :  { %v507_v20 = vsel %vm504_vm4, %v1742_v19, %v1683_v43 }
 0x156   :  { %v514_v26 = vmul.f32 %v510_v10, %v507_v20  ;;  %v444_v20 = vld [vmem:[#allocation5 + $0x140] sm:$0xff] }
 0x158   :  { %v749_v27 = vpack.c.bf16 %v536_v23, %v514_v26  ;;  %v466_v26 = vld [vmem:[#allocation5 + $0x160] sm:$0xff] }
 0x159   :  { %348 = vrot.lane.b32.xlu1 %v1512_v56, %s1371_s1  ;;  %392 = vrot.lane.b32.xlu2 %v1512_v56, %s1372_s27 }
 0x15a   :  { %678 = vrot.lane.b32.xlu0 %v1675_v41, %s1388_s22  ;;  %833 = vmatpush.bf16.msrb.mxu0 %v749_v27  ;;  %v400_v41 = vld [vmem:[#allocation5 + $0x100] sm:$0xff] }
 0x15b   :  { %v1754_v30 = vpop.permute.xlu1 %564  ;;  %v1756_v32 = vpop.permute.xlu2 %500 }
 0x15c   :  { %v1758_v37 = vpop.permute.xlu0 %432  ;;  %v506_v27 = vsel %vm504_vm4, %v1683_v43, %v1756_v32 }
 0x161   :  { %326 = vrot.lane.b32.xlu1 %v1512_v56, %s1373_s28  ;;  %370 = vrot.lane.b32.xlu2 %v1512_v56, %s1370_s2  ;;  %v485_v56 = vsel %vm482_vm5, %v1695_v46, %v1671_v39 }
 0x162   :  { %280 = vrot.lane.b32.xlu0 %v1504_v54, %s1374_s29 }
 0x163   :  { %v1767_v50 = vpop.permute.xlu1 %436  ;;  %v1769_v53 = vpop.permute.xlu2 %480 }
 0x164   :  { %v486_v57 = vsel %vm482_vm5, %v1769_v53, %v1695_v46  ;;  %v1775_v1 = vpop.permute.xlu0 %410  ;;  %v442_v23 = vsel %vm438_vm6, %v1767_v50, %v1685_v44  ;;  %v493_v46 = vmul.f32 %v489_v55, %v485_v56  ;;  %v353_v56 = vsel %vm350_vm11, %v1569_v3, %v1560_v0 }
 0x165   :  { %v492_v4 = vmul.f32 %v488_v49, %v486_v57  ;;  %v448_v62 = vmul.f32 %v444_v20, %v442_v23 }
 0x167   :  { %v745_v10 = vpack.c.bf16 %v1528_v61, %v492_v4  ;;  %v511_v61 = vld [vmem:[#allocation5 + $0x1c8] sm:$0xff] }
 0x168   :  { %v533_v4 = vld [vmem:[#allocation5 + $0x1e8] sm:$0xff]  ;;  %v515_v20 = vmul.f32 %v511_v61, %v506_v27  ;;  %v356_v61 = vld [vmem:[#allocation5 + $0xc0] sm:$0xff] }
 0x169   :  { %302 = vrot.lane.b32.xlu1 %v1504_v54, %s1375_s30  ;;  %654 = vrot.lane.b32.xlu2 %v1633_v25, %s1386_s20 }
 0x16a   :  { %258 = vrot.lane.b32.xlu0 %v1504_v54, %s1365_s14  ;;  %834 = vmatpush.bf16.msrb.mxu0 %v745_v10 }
 0x16b   :  { %v1794_v49 = vpop.permute.xlu1 %414  ;;  %v1796_v57 = vpop.permute.xlu2 %458 }
 0x16c   :  { %2338 = vst [vmem:[#allocation23_spill] sm:$0xff] %v1794_v49  ;;  %v464_v10 = vsel %vm460_vm7, %v1796_v57, %v1738_v5  ;;  %v523_v35 = vpop.permute.xlu0 %522  ;;  %v420_v43 = vsel %vm416_vm9, %v1794_v49, %v1713_v52 }
 0x16d   :  { %2339 = vst [vmem:[#allocation24_spill] sm:$0xff] %v1796_v57  ;;  %v470_v38 = vmul.f32 %v466_v26, %v464_v10  ;;  %v528_v16 = vsel %vm526_vm3, %v1648_v29, %v523_v35  ;;  %v397_v26 = vsel %vm394_vm8, %v1606_v15, %v1592_v11  ;;  %v782_v29 = vld [vmem:[%s2298_s4 + $0x10] sm:$0xff]  ;;  %v426_v25 = vmul.f32 %v422_v31, %v420_v43  ;;  %v378_v57 = vld [vmem:[#allocation5 + $0xe0] sm:$0xff] }
 0x16e   :  { %v537_v23 = vmul.f32 %v533_v4, %v528_v16  ;;  %v375_v16 = vsel %vm372_vm10, %v1618_v18, %v1587_v8  ;;  %v441_v31 = vsel %vm438_vm6, %v1685_v44, %v1758_v37  ;;  %v467_v4 = vld [vmem:[#allocation5 + $0x168] sm:$0xff]  ;;  %v463_v44 = vsel %vm460_vm7, %v1738_v5, %v1697_v47 }
 0x16f   :  { %v741_v10 = vpack.c.bf16 %v470_v38, %v448_v62  ;;  %v404_v38 = vmul.f32 %v400_v41, %v397_v26  ;;  %v445_v62 = vld [vmem:[#allocation5 + $0x148] sm:$0xff]  ;;  %v382_v41 = vmul.f32 %v378_v57, %v375_v16  ;;  %v334_v26 = vld [vmem:[#allocation5 + $0xa0] sm:$0xff]  ;;  %v419_v5 = vsel %vm416_vm9, %v1713_v52, %v1775_v1 }
 0x170   :  { %v750_v49 = vpack.c.bf16 %v537_v23, %v515_v20  ;;  %v449_v57 = vmul.f32 %v445_v62, %v441_v31  ;;  %v423_v16 = vld [vmem:[#allocation5 + $0x128] sm:$0xff] }
 0x171   :  { %546 = vrot.lane.b32.xlu1 %v1552_v63, %s1383_s0  ;;  %235 = vrot.lane.b32.xlu2 %v1504_v54, %s1376_s9  ;;  %v737_v23 = vpack.c.bf16 %v426_v25, %v404_v38  ;;  %v780_v25 = vld [vmem:[%s2298_s4] sm:$0xff]  ;;  %v427_v52 = vmul.f32 %v423_v16, %v419_v5 }
 0x172   :  { %795 = vperm.xlu0 %1282, %v782_v29   ;;  %835 = vmatpush.bf16.msrb.mxu0 %v741_v10  ;;  %v746_v29 = vpack.c.bf16 %v1520_v59, %v493_v46  ;;  %v360_v10 = vmul.f32 %v356_v61, %v353_v56  ;;  %v1001_v38 = vld [vmem:[%s2300_s6] sm:$0xff]  ;;  %v401_v59 = vld [vmem:[#allocation5 + $0x108] sm:$0xff]  ;;  %v396_v46 = vsel %vm394_vm8, %v1592_v11, %v1646_v28 }
 0x173   :  { %869 = vmatpush.bf16.msrb.mxu2 %v750_v49  ;;  %v1841_v55 = vpop.permute.xlu1 %524  ;;  %v1843_v27 = vpop.permute.xlu2 %566  ;;  %v331_v49 = vsel %vm2316_vm12, %v1589_v9, %v1602_v13  ;;  %v357_v56 = vld [vmem:[#allocation5 + $0xc8] sm:$0xff]  ;;  %v598_v54 = vld [vmem:[#allocation5 + $0x240] sm:$0xff]  ;;  %v716_v9 = vld [vmem:[#allocation5 + $0x358] sm:$0xff] }
 0x174   :  { %2340 = vst [vmem:[#allocation25_spill] sm:$0xff] %v1843_v27  ;;  %v527_v43 = vsel %vm526_vm3, %v523_v35, %v1841_v55  ;;  %v1852_v20 = vpop.permute.xlu0 %544  ;;  %v471_v35 = vmul.f32 %v467_v4, %v463_v44  ;;  %v338_v62 = vmul.f32 %v334_v26, %v331_v49  ;;  %v733_v31 = vpack.c.bf16 %v382_v41, %v360_v10  ;;  %v512_v41 = vld [vmem:[#allocation5 + $0x1d0] sm:$0xff]  ;;  %v379_v49 = vld [vmem:[#allocation5 + $0xe8] sm:$0xff] }
 0x175   :  { %2341 = vst [vmem:[#allocation26_spill] sm:$0xff] %v1852_v20  ;;  %v352_v4 = vsel %vm350_vm11, %v1560_v0, %v1699_v48  ;;  %v405_v44 = vmul.f32 %v401_v59, %v396_v46 }
 0x176   :  { %836 = vmatpush.bf16.msrb.mxu0 %v737_v23  ;;  %v742_v61 = vpack.c.bf16 %v471_v35, %v449_v57  ;;  %v534_v23 = vld [vmem:[#allocation5 + $0x1f0] sm:$0xff]  ;;  %v374_v57 = vsel %vm372_vm10, %v1587_v8, %v1616_v17  ;;  %v729_v10 = vpack.c.bf16 %v338_v62, %v1476_v42  ;;  %v361_v0 = vmul.f32 %v357_v56, %v352_v4  ;;  %v1002_v42 = vld [vmem:[%s2300_s6 + $0x8] sm:$0xff]  ;;  %v642_v62 = vld [vmem:[#allocation5 + $0x280] sm:$0xff] }
 0x177   :  { %870 = vmatpush.bf16.msrb.mxu2 %v746_v29  ;;  %v738_v5 = vpack.c.bf16 %v427_v52, %v405_v44  ;;  %v330_v35 = vsel %vm2316_vm12, %v1602_v13, %v1629_v22  ;;  %v383_v8 = vmul.f32 %v379_v49, %v374_v57  ;;  %v265_v44 = vsel %vm262_vm14, %v1604_v14, %v1687_v45  ;;  %v247_v57 = vld [vmem:[#allocation5 + $0x8] sm:$0xff] }
 0x178   :  { %vm570_vm12 = vcmp.lt.s32.totalorder %v1631_v24, 94 }
 0x179   :  { %785 = vperm.xlu1 %1283, %v780_v25   ;;  %568 = vrot.lane.b32.xlu2 %v1552_v63, %s1381_s15  ;;  %v335_v25 = vld [vmem:[#allocation5 + $0xa8] sm:$0xff]  ;;  %v734_v13 = vpack.c.bf16 %v383_v8, %v361_v0 }
 0x17a   :  { %1007 = vperm.xlu0 %1282, %v1001_v38   ;;  %837 = vmatpush.bf16.msrb.mxu0 %v733_v31  ;;  %v1895_v38 = vmul.f32 %v534_v23, %v527_v43  ;;  %v339_v46 = vmul.f32 %v335_v25, %v330_v35  ;;  %v2342_v43 = vpack.c.bf16 %v1720_v58, %v1722_v60  ;;  %v269_v60 = vld [vmem:[#allocation5 + $0x28] sm:$0xff] }
 0x17b   :  { %871 = vmatpush.bf16.msrb.mxu2 %v742_v61  ;;  %v1879_v26 = vpop.permute.xlu1 %628  ;;  %v1881_v11 = vpop.permute.xlu2 %608  ;;  %v713_v61 = vld [vmem:[#allocation5 + $0x340] sm:$0xff]  ;;  %v273_v0 = vmul.f32 %v269_v60, %v265_v44 }
 0x17c   :  { %v503_v29 = vpop.permute.xlu0 %502  ;;  %v730_v58 = vpack.c.bf16 %v339_v46, %v1468_v36  ;;  %v244_v36 = vsel %vm241_vm15, %v1673_v40, %v1627_v21  ;;  %v695_v44 = vld [vmem:[#allocation5 + $0x300] sm:$0xff] }
 0x17d   :  { %v505_v16 = vsel %vm504_vm4, %v1756_v32, %v503_v29  ;;  %v1004_v32 = vld [vmem:[%s2300_s6 + $0x18] sm:$0xff]  ;;  %v508_v49 = vsel %vm504_vm4, %v503_v29, %v1742_v19  ;;  %v251_v19 = vmul.f32 %v247_v57, %v244_v36  ;;  %v2343_v29 = vpack.c.bf16 %v1658_v34, %v1656_v33  ;;  %v704_v33 = vld [vmem:[#allocation5 + $0x320] sm:$0xff] }
 0x17e   :  { %v1897_v59 = vmul.f32 %v512_v41, %v505_v16  ;;  %838 = vmatpush.bf16.msrb.mxu0 %v729_v10  ;;  %v513_v41 = vld [vmem:[#allocation5 + $0x1d8] sm:$0xff]  ;;  %vm2317_vm4 = vcmp.lt.s32.totalorder %v1631_v24, 124 }
 0x17f   :  { %872 = vmatpush.bf16.msrb.mxu2 %v738_v5  ;;  %v535_v16 = vld [vmem:[#allocation5 + $0x1f8] sm:$0xff]  ;;  %v530_v5 = vsel %vm526_vm3, %v1841_v55, %v1711_v51  ;;  %v517_v25 = vmul.f32 %v513_v41, %v508_v49  ;;  %v1252_v51 = vld [vmem:[%s2297_s3 + $0x4] sm:$0xf0]  ;;  %vm614_vm3 = vcmp.lt.s32.totalorder %v1631_v24, 64  ;;  %v686_v41 = vld [vmem:[#allocation5 + $0x2e0] sm:$0xff] }
 0x180   :  { %v539_v55 = vmul.f32 %v535_v16, %v530_v5 }
 0x181   :  { %1012 = vperm.xlu1 %1283, %v1002_v42  }
 0x182   :  { %1022 = vperm.xlu0 %1282, %v1004_v32   ;;  %839 = vmatpush.bf16.msrb.mxu0 %v2342_v43  ;;  %v1212_v32 = vld [vmem:[%s2297_s3] sm:$0xf]  ;;  %v752_v43 = vpack.c.bf16 %v539_v55, %v517_v25  ;;  %v714_v25 = vld [vmem:[#allocation5 + $0x348] sm:$0xff] }
 0x183   :  { %873 = vmatpush.bf16.msrb.mxu2 %v734_v13  ;;  %v1912_v31 = vpop.permute.xlu1 %606  ;;  %v1914_v52 = vpop.permute.xlu2 %674  ;;  %v722_v13 = vpack.c.bf16 %v273_v0, %v251_v19  ;;  %v1982_v0 = vld [vmem:[%s2297_s3 + $0x10] sm:$0xff] }
 0x184   :  { %v631_v56 = vpop.permute.xlu0 %630  ;;  %v1963_v34 = vsel %vm614_vm3, %v1912_v31, %v1881_v11 }
 0x185   :  { %v1920_v4 = vsel %vm636_vm13, %v1879_v26, %v631_v56  ;;  %v708_v36 = vmul.f32 %v704_v33, %v1963_v34 }
 0x186   :  { %v717_v23 = vmul.f32 %v713_v61, %v1920_v4  ;;  %v1953_v61 = vor.u32 %v1252_v51, %v1212_v32 }
 0x187   :  { %874 = vmatpush.bf16.msrb.mxu2 %v730_v58 }
 0x188   :  { %v773_v10 = vpack.c.bf16 %v717_v23, %v717_v23 }
 0x18a   :  { %v822_v35 = vsel %vm820_vm0, %v773_v10, 0 }
 0x18b   :  { %875 = vmatpush.bf16.msrb.mxu2 %v2343_v29  ;;  %853 = vmatpush.bf16.msrb.mxu1 %v822_v35  ;;  %v1943_v42 = vpop.permute.xlu1 %650  ;;  %v1945_v8 = vpop.permute.xlu2 %652  ;;  %v805_v35 = vunpack.c.l.b16 %v1982_v0 }
 0x18c   :  { %v587_v46 = vpop.permute.xlu0 %586 }
 0x18f   :  { %876 = vmatpush.bf16.msrb.mxu2 %v722_v13 }
 0x192   :  { %877 = vmatmul.bf16.vlgmr.msrb.gmra.mxu2 %v1953_v61 }
 0x193   :  { %941 = vmatpush.bf16.msra.mxu2 %v752_v43  ;;  %v1965_v58 = vpop.permute.xlu1 %672  ;;  %v1967_v60 = vpop.permute.xlu2 %656  ;;  %v1998_v43 = vpack.c.b16 %v805_v35, %v805_v35 }
 0x194   :  { %v1969_v23 = vpop.permute.xlu0 %584  ;;  %v683_v49 = vsel %vm2317_vm4, %v1965_v58, %v1914_v52 }
 0x195   :  { %v595_v57 = vsel %vm592_vm2, %v1969_v23, %v587_v46  ;;  %v690_v16 = vmul.f32 %v686_v41, %v683_v49  ;;  %v705_v41 = vld [vmem:[#allocation5 + $0x328] sm:$0xff] }
 0x196   :  { %v699_v10 = vmul.f32 %v695_v44, %v595_v57 }
 0x197   :  { %v765_v55 = vpack.c.bf16 %v690_v16, %v1579_v7  ;;  %v687_v16 = vld [vmem:[#allocation5 + $0x2e8] sm:$0xff] }
 0x198   :  { %v769_v5 = vpack.c.bf16 %v708_v36, %v699_v10 }
 0x19a   :  { %854 = vmatpush.bf16.msrb.mxu1 %v769_v5 }
 0x19b   :  { %v1985_v19 = vpop.permute.xlu1 %632  ;;  %v1987_v29 = vpop.permute.xlu2 %590 }
 0x19c   :  { %v1992_v32 = vsel %vm636_vm13, %v631_v56, %v1985_v19  ;;  %v1994_v51 = vpop.permute.xlu0 %610  ;;  %v696_v56 = vld [vmem:[#allocation5 + $0x308] sm:$0xff] }
 0x19d   :  { %2344 = vst [vmem:[#allocation27_spill] sm:$0xff] %v1992_v32  ;;  %v718_v13 = vmul.f32 %v714_v25, %v1992_v32  ;;  %v2005_v49 = vsel %vm614_vm3, %v1881_v11, %v1994_v51 }
 0x19e   :  { %855 = vmatpush.bf16.msrb.mxu1 %v765_v55  ;;  %2345 = vst [vmem:[#allocation28_spill] sm:$0xff] %v2005_v49  ;;  %v709_v11 = vmul.f32 %v705_v41, %v2005_v49  ;;  %v664_v41 = vld [vmem:[#allocation5 + $0x2a0] sm:$0xff]  ;;  %v596_v49 = vsel %vm592_vm2, %v1987_v29, %v1969_v23 }
 0x19f   :  { %v774_v33 = vpack.c.bf16 %v718_v13, %v718_v13  ;;  %v602_v23 = vmul.f32 %v598_v54, %v596_v49 }
 0x1a1   :  { %v825_v44 = vsel %vm820_vm0, %v774_v33, 0  ;;  %v665_v33 = vld [vmem:[#allocation5 + $0x2a8] sm:$0xff] }
 0x1a2   :  { %882 = vmatmul.bf16.gmra.mxu2 %v1998_v43  ;;  %889 = vmatpush.bf16.msrb.mxu3 %v825_v44  ;;  %v643_v44 = vld [vmem:[#allocation5 + $0x288] sm:$0xff] }
 0x1a3   :  { %v2008_v7 = vpop.permute.xlu1 %588  ;;  %v2010_v36 = vpop.permute.xlu2 %260 }
 0x1a4   :  { %v2015_v10 = vsel %vm592_vm2, %v587_v46, %v2008_v7  ;;  %v2017_v5 = vpop.permute.xlu0 %676  ;;  %v661_v46 = vsel %vm658_vm1, %v1943_v42, %v1945_v8 }
 0x1a5   :  { %2346 = vst [vmem:[#allocation29_spill] sm:$0xff] %v2015_v10  ;;  %v700_v25 = vmul.f32 %v696_v56, %v2015_v10  ;;  %v682_v35 = vsel %vm2317_vm4, %v1914_v52, %v2017_v5  ;;  %v669_v21 = vmul.f32 %v665_v33, %v661_v46  ;;  %v662_v56 = vsel %vm658_vm1, %v1967_v60, %v1943_v42  ;;  %v620_v42 = vld [vmem:[#allocation5 + $0x260] sm:$0xff]  ;;  %v621_v46 = vld [vmem:[#allocation5 + $0x268] sm:$0xff] }
 0x1a6   :  { %v691_v55 = vmul.f32 %v687_v16, %v682_v35  ;;  %v599_v16 = vld [vmem:[#allocation5 + $0x248] sm:$0xff]  ;;  %vm548_vm4 = vcmp.lt.s32.totalorder %v1631_v24, 96 }
 0x1a7   :  { %v770_v13 = vpack.c.bf16 %v709_v11, %v700_v25 }
 0x1a8   :  { %v766_v52 = vpack.c.bf16 %v691_v55, %v1594_v12  ;;  %v668_v12 = vmul.f32 %v664_v41, %v662_v56  ;;  %v603_v55 = vmul.f32 %v599_v16, %v595_v57  ;;  %v625_v56 = vmul.f32 %v621_v46, %v1963_v34 }
 0x1a9   :  { %890 = vmatpush.bf16.msrb.mxu3 %v770_v13  ;;  %v647_v13 = vmul.f32 %v643_v44, %v1920_v4  ;;  %v577_v4 = vld [vmem:[#allocation5 + $0x228] sm:$0xff] }
 0x1aa   :  { %v555_v44 = vld [vmem:[#allocation5 + $0x208] sm:$0xff] }
 0x1ab   :  { %v635_v45 = vpop.permute.xlu1 %634  ;;  %v2038_v25 = vpop.permute.xlu2 %562  ;;  %v762_v22 = vpack.c.bf16 %v669_v21, %v647_v13  ;;  %v266_v21 = vsel %vm262_vm14, %v2010_v36, %v1604_v14  ;;  %v246_v13 = vld [vmem:[#allocation5] sm:$0xff] }
 0x1ac   :  { %v640_v11 = vsel %vm636_vm13, %v635_v45, %v1879_v26  ;;  %v2040_v35 = vpop.permute.xlu0 %612  ;;  %v1251_v14 = vld [vmem:[%s2297_s3 + $0x4] sm:$0xf] }
 0x1ad   :  { %v646_v33 = vmul.f32 %v642_v62, %v640_v11  ;;  %891 = vmatpush.bf16.msrb.mxu3 %v766_v52  ;;  %v618_v26 = vsel %vm614_vm3, %v2040_v35, %v1912_v31  ;;  %v572_v62 = vsel %vm570_vm12, %v1754_v30, %v1843_v27  ;;  %v550_v31 = vsel %vm548_vm4, %v1740_v6, %v1852_v20  ;;  %v268_v52 = vld [vmem:[#allocation5 + $0x20] sm:$0xff]  ;;  %v491_v20 = vld [vmem:[#allocation5 + $0x198] sm:$0xff] }
 0x1ae   :  { %v624_v57 = vmul.f32 %v620_v42, %v618_v26  ;;  %v720_v16 = vmul.f32 %v716_v9, %v640_v11  ;;  %v581_v27 = vmul.f32 %v577_v4, %v572_v62  ;;  %v559_v10 = vmul.f32 %v555_v44, %v550_v31  ;;  %v1214_v11 = vld [vmem:[%s2297_s3 + $0x8] sm:$0xf0]  ;;  %v707_v62 = vld [vmem:[#allocation5 + $0x338] sm:$0xff] }
 0x1af   :  { %v761_v41 = vpack.c.bf16 %v668_v12, %v646_v33  ;;  %v758_v42 = vpack.c.bf16 %v625_v56, %v603_v55  ;;  %v272_v33 = vmul.f32 %v268_v52, %v266_v21  ;;  %v490_v12 = vld [vmem:[#allocation5 + $0x190] sm:$0xff]  ;;  %v698_v56 = vld [vmem:[#allocation5 + $0x318] sm:$0xff]  ;;  %v2092_v21 = vor.u32 %v1251_v14, %v1214_v11 }
 0x1b0   :  { %v757_v34 = vpack.c.bf16 %v624_v57, %v602_v23  ;;  %v715_v55 = vld [vmem:[#allocation5 + $0x350] sm:$0xff]  ;;  %v776_v4 = vpack.c.bf16 %v720_v16, %v720_v16  ;;  %v573_v16 = vsel %vm570_vm12, %v2038_v25, %v1754_v30  ;;  %v447_v14 = vld [vmem:[#allocation5 + $0x158] sm:$0xff] }
 0x1b1   :  { %892 = vmatpush.bf16.msrb.mxu3 %v762_v22  ;;  %856 = vmatpush.bf16.msrb.mxu1 %v761_v41  ;;  %v754_v41 = vpack.c.bf16 %v581_v27, %v559_v10  ;;  %v554_v27 = vld [vmem:[#allocation5 + $0x200] sm:$0xff] }
 0x1b3   :  { %v2066_v32 = vpop.permute.xlu1 %237  ;;  %v2086_v44 = vpop.permute.xlu2 %392 }
 0x1b4   :  { %v245_v54 = vsel %vm241_vm15, %v2066_v32, %v1673_v40  ;;  %v479_v22 = vpop.permute.xlu0 %478  ;;  %v2084_v40 = vsel %vm636_vm13, %v1985_v19, %v635_v45  ;;  %v576_v19 = vld [vmem:[#allocation5 + $0x220] sm:$0xff] }
 0x1b5   :  { %v250_v46 = vmul.f32 %v246_v13, %v245_v54  ;;  %v483_v9 = vsel %vm482_vm5, %v479_v22, %v1769_v53  ;;  %893 = vmatpush.bf16.msrb.mxu3 %v758_v42  ;;  %v484_v53 = vsel %vm482_vm5, %v1671_v39, %v479_v22  ;;  %857 = vmatpush.bf16.msrb.mxu1 %v757_v34  ;;  %vm813_vm5 = vcmask 719872   ;;  %v706_v54 = vld [vmem:[#allocation5 + $0x330] sm:$0xff] }
 0x1b6   :  { %v495_v31 = vmul.f32 %v491_v20, %v483_v9  ;;  %v494_v23 = vmul.f32 %v490_v12, %v484_v53  ;;  %v719_v45 = vmul.f32 %v715_v55, %v2084_v40  ;;  %v711_v13 = vmul.f32 %v707_v62, %v618_v26  ;;  %v446_v9 = vld [vmem:[#allocation5 + $0x150] sm:$0xff]  ;;  %v469_v55 = vld [vmem:[#allocation5 + $0x178] sm:$0xff]  ;;  %v2348_v62 = vld [vmem:[#allocation24_spill] sm:$0xff] }
 0x1b7   :  { %v721_v57 = vpack.c.bf16 %v272_v33, %v250_v46  ;;  %v2347_v39 = vpack.c.bf16 %v1895_v38, %v1897_v59  ;;  %v702_v20 = vmul.f32 %v698_v56, %v596_v49  ;;  %v580_v42 = vmul.f32 %v576_v19, %v573_v16  ;;  %v425_v19 = vld [vmem:[#allocation5 + $0x138] sm:$0xff]  ;;  %v2349_v16 = vld [vmem:[#allocation23_spill] sm:$0xff] }
 0x1b8   :  { %v748_v52 = vpack.c.bf16 %v1552_v63, %v495_v31  ;;  %v831_v63 = vsel %vm820_vm0, %v776_v4, 0  ;;  %v747_v38 = vpack.c.bf16 %v1562_v2, %v494_v23  ;;  %v775_v59 = vpack.c.bf16 %v719_v45, %v719_v45  ;;  %v424_v45 = vld [vmem:[#allocation5 + $0x130] sm:$0xff] }
 0x1b9   :  { %840 = vmatpush.bf16.msrb.mxu0 %v721_v57  ;;  %894 = vmatpush.bf16.msrb.mxu3 %v754_v41  ;;  %v2117_v49 = vsel %vm614_vm3, %v1994_v51, %v2040_v35  ;;  %v772_v34 = vpack.c.bf16 %v711_v13, %v702_v20  ;;  %v2123_v33 = vsel %vm592_vm2, %v2008_v7, %v1987_v29  ;;  %v468_v7 = vld [vmem:[#allocation5 + $0x170] sm:$0xff]  ;;  %v806_v41 = vunpack.c.h.b16 %v1982_v0 }
 0x1ba   :  { %942 = vmatpush.bf16.msra.mxu2 %v748_v52  ;;  %v710_v46 = vmul.f32 %v706_v54, %v2117_v49  ;;  %v828_v51 = vsel %vm820_vm0, %v775_v59, 0  ;;  %v395_v0 = vsel %vm394_vm8, %v1646_v28, %v2086_v44  ;;  %vm2350_vm2 = vcmp.lt.s32.totalorder %v1631_v24, 124 }
 0x1bb   :  { %v2103_v10 = vpop.permute.xlu1 %540  ;;  %v371_v12 = vpop.permute.xlu2 %370  ;;  %v2160_v59 = vpack.c.b16 %v806_v41, %v806_v41 }
 0x1bc   :  { %v551_v30 = vsel %vm548_vm4, %v2103_v10, %v1740_v6  ;;  %v435_v26 = vpop.permute.xlu0 %434  ;;  %841 = vmatmul.bf16.vlgmr.msrb.gmra.mxu0 %v1953_v61  ;;  %1220 = vmatmul.msk.bf16.vlgmr.msrb.gmra.mxu3 %vm813_vm5, %v2092_v21  ;;  %v697_v6 = vld [vmem:[#allocation5 + $0x310] sm:$0xff] }
 0x1bd   :  { %905 = vmatpush.bf16.msra.mxu0 %v2347_v39  ;;  %961 = vmatpush.bf16.msra.mxu3 %v831_v63  ;;  %v558_v22 = vmul.f32 %v554_v27, %v551_v30  ;;  %v701_v35 = vmul.f32 %v697_v6, %v2123_v33  ;;  %v439_v11 = vsel %vm438_vm6, %v435_v26, %v1767_v50  ;;  %v402_v39 = vld [vmem:[#allocation5 + $0x110] sm:$0xff]  ;;  %v403_v63 = vld [vmem:[#allocation5 + $0x118] sm:$0xff] }
 0x1be   :  { %v440_v29 = vsel %vm438_vm6, %v1758_v37, %v435_v26  ;;  %v451_v56 = vmul.f32 %v447_v14, %v439_v11  ;;  %v398_v27 = vsel %vm394_vm8, %v2086_v44, %v1606_v15  ;;  %v380_v30 = vld [vmem:[#allocation5 + $0xf0] sm:$0xff]  ;;  %v406_v54 = vmul.f32 %v402_v39, %v395_v0  ;;  %v359_v6 = vld [vmem:[#allocation5 + $0xd8] sm:$0xff]  ;;  %vm2351_vm6 = vmmov %vm2350_vm2 }
 0x1bf   :  { %v753_v2 = vpack.c.bf16 %v580_v42, %v558_v22  ;;  %v771_v50 = vpack.c.bf16 %v710_v46, %v701_v35  ;;  %v450_v37 = vmul.f32 %v446_v9, %v440_v29  ;;  %v407_v28 = vmul.f32 %v403_v63, %v398_v27  ;;  %v381_v22 = vld [vmem:[#allocation5 + $0xf8] sm:$0xff]  ;;  %v2354_v39 = vld [vmem:[#allocation27_spill] sm:$0xff] }
 0x1c0   :  { %v376_v15 = vsel %vm372_vm10, %v371_v12, %v1618_v18  ;;  %v689_v35 = vld [vmem:[#allocation5 + $0x2f8] sm:$0xff]  ;;  %vm2364_vm8 = vcmp.lt.s32.totalorder %v1631_v24, 15 }
 0x1c1   :  { %906 = vmatpush.bf16.msra.mxu0 %v747_v38  ;;  %962 = vmatpush.bf16.msra.mxu3 %v772_v34  ;;  %v358_v34 = vld [vmem:[#allocation5 + $0xd0] sm:$0xff]  ;;  %v385_v29 = vmul.f32 %v381_v22, %v376_v15 }
 0x1c2   :  { %858 = vmatpush.bf16.msrb.mxu1 %v753_v2  ;;  %v2358_v22 = vld [vmem:[#allocation13_spill] sm:$0xff] }
 0x1c3   :  { %v457_v4 = vpop.permute.xlu1 %456  ;;  %v655_v44 = vpop.permute.xlu2 %654 }
 0x1c4   :  { %v461_v53 = vsel %vm460_vm7, %v457_v4, %v2348_v62  ;;  %v462_v31 = vsel %vm460_vm7, %v1697_v47, %v457_v4  ;;  %v413_v57 = vpop.permute.xlu0 %412  ;;  %v667_v4 = vld [vmem:[#allocation5 + $0x2b8] sm:$0xff]  ;;  %v660_v62 = vsel %vm658_vm1, %v1945_v8, %v655_v44 }
 0x1c5   :  { %1218 = vmatmul.msk.bf16.vlgmr.msrb.gmra.mxu1 %vm813_vm5, %v2092_v21  ;;  %v472_v23 = vmul.f32 %v468_v7, %v462_v31  ;;  %v473_v52 = vmul.f32 %v469_v55, %v461_v53  ;;  %v417_v13 = vsel %vm416_vm9, %v413_v57, %v2349_v16  ;;  %v418_v47 = vsel %vm416_vm9, %v1775_v1, %v413_v57  ;;  %vm2366_vm9 = vmmov %vm2364_vm8 }
 0x1c6   :  { %925 = vmatpush.bf16.msra.mxu1 %v828_v51  ;;  %v373_v1 = vsel %vm372_vm10, %v1616_v17, %v371_v12  ;;  %v428_v26 = vmul.f32 %v424_v45, %v418_v47  ;;  %v429_v38 = vmul.f32 %v425_v19, %v417_v13  ;;  %v688_v51 = vld [vmem:[#allocation5 + $0x2f0] sm:$0xff]  ;;  %v781_v12 = vld [vmem:[%s2298_s4 + $0x8] sm:$0xff]  ;;  %v337_v47 = vld [vmem:[#allocation5 + $0xb8] sm:$0xff]  ;;  %vm2368_vm10 = vcmp.lt.s32.totalorder %v1631_v24, 1 }
 0x1c7   :  { %v743_v20 = vpack.c.bf16 %v472_v23, %v450_v37  ;;  %v744_v42 = vpack.c.bf16 %v473_v52, %v451_v56  ;;  %v384_v2 = vmul.f32 %v380_v30, %v373_v1  ;;  %790 = vperm.xlu2 %1284, %v781_v12   ;;  %v644_v37 = vld [vmem:[#allocation5 + $0x290] sm:$0xff]  ;;  %v645_v56 = vld [vmem:[#allocation5 + $0x298] sm:$0xff] }
 0x1c8   :  { %v739_v11 = vpack.c.bf16 %v428_v26, %v406_v54  ;;  %v740_v18 = vpack.c.bf16 %v429_v38, %v407_v28  ;;  %v600_v23 = vld [vmem:[#allocation5 + $0x250] sm:$0xff]  ;;  %v623_v52 = vld [vmem:[#allocation5 + $0x278] sm:$0xff]  ;;  %v648_v63 = vmul.f32 %v644_v37, %v2354_v39  ;;  %v649_v0 = vmul.f32 %v645_v56, %v2084_v40  ;;  %v2356_v54 = vld [vmem:[#allocation16_spill] sm:$0xff] }
 0x1c9   :  { %907 = vmatpush.bf16.msra.mxu0 %v743_v20  ;;  %943 = vmatpush.bf16.msra.mxu2 %v744_v42  ;;  %v2352_v19 = vld [vmem:[#allocation17_spill] sm:$0xff]  ;;  %v601_v42 = vld [vmem:[#allocation5 + $0x258] sm:$0xff]  ;;  %v627_v26 = vmul.f32 %v623_v52, %v2117_v49 }
 0x1ca   :  { %926 = vmatpush.bf16.msra.mxu1 %v771_v50  ;;  %v622_v20 = vld [vmem:[#allocation5 + $0x270] sm:$0xff]  ;;  %v605_v49 = vmul.f32 %v601_v42, %v2123_v33  ;;  %v2363_v12 = vld [vmem:[#allocation22_spill] sm:$0xff] }
 0x1cb   :  { %v349_v46 = vpop.permute.xlu1 %348  ;;  %v2355_v30 = vld [vmem:[#allocation29_spill] sm:$0xff]  ;;  %v236_v38 = vpop.permute.xlu2 %235  ;;  %v271_v56 = vld [vmem:[#allocation5 + $0x38] sm:$0xff] }
 0x1cc   :  { %v351_v17 = vsel %vm350_vm11, %v1699_v48, %v349_v46  ;;  %v354_v9 = vsel %vm350_vm11, %v349_v46, %v1569_v3  ;;  %v679_v14 = vpop.permute.xlu0 %678  ;;  %846 = vmatmul.bf16.gmra.mxu0 %v1998_v43  ;;  %v659_v48 = vsel %vm658_vm1, %v655_v44, %v1967_v60  ;;  %1221 = vmatmul.msk.bf16.gmra.mxu3 %vm813_vm5, %v2160_v59  ;;  %v666_v3 = vld [vmem:[#allocation5 + $0x2b0] sm:$0xff]  ;;  %vm2357_vm1 = vcmp.lt.s32.totalorder %v1631_v24, 127  ;;  %v2360_v46 = vld [vmem:[#allocation28_spill] sm:$0xff]  ;;  %vm2370_vm11 = vmmov %vm2368_vm10 }
 0x1cd   :  { %v362_v7 = vmul.f32 %v358_v34, %v351_v17  ;;  %v363_v55 = vmul.f32 %v359_v6, %v354_v9  ;;  %v681_v53 = vsel %vm2350_vm2, %v2017_v5, %v679_v14  ;;  %v684_v31 = vsel %vm2351_vm6, %v679_v14, %v1965_v58  ;;  %908 = vmatpush.bf16.msra.mxu0 %v739_v11  ;;  %v2353_v5 = vld [vmem:[#allocation20_spill] sm:$0xff]  ;;  %v336_v58 = vld [vmem:[#allocation5 + $0xb0] sm:$0xff]  ;;  %vm2359_vm7 = vmmov %vm2357_vm1 }
 0x1ce   :  { %944 = vmatpush.bf16.msra.mxu2 %v740_v18  ;;  %v692_v60 = vmul.f32 %v688_v51, %v681_v53  ;;  %v693_v57 = vmul.f32 %v689_v35, %v684_v31  ;;  %v670_v8 = vmul.f32 %v666_v3, %v660_v62  ;;  %v671_v45 = vmul.f32 %v667_v4, %v659_v48  ;;  %v2361_v9 = vld [vmem:[#allocation11_spill] sm:$0xff]  ;;  %v2362_v35 = vld [vmem:[#allocation12_spill] sm:$0xff]  ;;  %v292_v11 = vld [vmem:[#allocation5 + $0x50] sm:$0xff] }
 0x1cf   :  { %v735_v50 = vpack.c.bf16 %v384_v2, %v362_v7  ;;  %v736_v41 = vpack.c.bf16 %v385_v29, %v363_v55  ;;  %v604_v1 = vmul.f32 %v600_v23, %v2355_v30  ;;  %v626_v17 = vmul.f32 %v622_v20, %v2360_v46  ;;  %v293_v18 = vld [vmem:[#allocation5 + $0x58] sm:$0xff]  ;;  %v314_v33 = vld [vmem:[#allocation5 + $0x70] sm:$0xff] }
 0x1d0   :  { %v767_v16 = vpack.c.bf16 %v692_v60, %v2352_v19  ;;  %v768_v13 = vpack.c.bf16 %v693_v57, %v2353_v5  ;;  %v763_v6 = vpack.c.bf16 %v670_v8, %v648_v63  ;;  %v764_v2 = vpack.c.bf16 %v671_v45, %v649_v0  ;;  %v2365_v48 = vld [vmem:[#allocation14_spill] sm:$0xff]  ;;  %v2367_v60 = vld [vmem:[#allocation19_spill] sm:$0xff]  ;;  %v270_v37 = vld [vmem:[#allocation5 + $0x30] sm:$0xff] }
 0x1d1   :  { %909 = vmatpush.bf16.msra.mxu0 %v735_v50  ;;  %v759_v55 = vpack.c.bf16 %v626_v17, %v604_v1  ;;  %v760_v3 = vpack.c.bf16 %v627_v26, %v605_v49  ;;  %v315_v4 = vld [vmem:[#allocation5 + $0x78] sm:$0xff]  ;;  %v2371_v19 = vld [vmem:[#allocation21_spill] sm:$0xff] }
 0x1d2   :  { %945 = vmatpush.bf16.msra.mxu2 %v736_v41  ;;  %927 = vmatpush.bf16.msra.mxu1 %v767_v16  ;;  %v2369_v50 = vld [vmem:[#allocation18_spill] sm:$0xff]  ;;  %v248_v5 = vld [vmem:[#allocation5 + $0x10] sm:$0xff] }
 0x1d3   :  { %963 = vmatpush.bf16.msra.mxu3 %v768_v13  ;;  %v327_v27 = vpop.permute.xlu1 %326  ;;  %v249_v13 = vld [vmem:[#allocation5 + $0x18] sm:$0xff]  ;;  %v569_v63 = vpop.permute.xlu2 %568  ;;  %v578_v1 = vld [vmem:[#allocation5 + $0x230] sm:$0xff] }
 0x1d4   :  { %v329_v28 = vsel %vm2357_vm1, %v2356_v54, %v327_v27  ;;  %v332_v15 = vsel %vm2359_vm7, %v327_v27, %v2358_v22  ;;  %v281_v44 = vpop.permute.xlu0 %280  ;;  %v2373_v26 = vld [vmem:[#allocation25_spill] sm:$0xff]  ;;  %v557_v22 = vld [vmem:[#allocation5 + $0x218] sm:$0xff] }
 0x1d5   :  { %1219 = vmatmul.msk.bf16.gmra.mxu1 %vm813_vm5, %v2160_v59  ;;  %v340_v40 = vmul.f32 %v336_v58, %v329_v28  ;;  %v341_v34 = vmul.f32 %v337_v47, %v332_v15  ;;  %v285_v29 = vsel %vm2364_vm8, %v281_v44, %v2363_v12  ;;  %v286_v7 = vsel %vm2366_vm9, %v2365_v48, %v281_v44  ;;  %v2372_v47 = vld [vmem:[#allocation15_spill] sm:$0xff]  ;;  %v579_v28 = vld [vmem:[#allocation5 + $0x238] sm:$0xff]  ;;  %v1003_v24 = vld [vmem:[%s2300_s6 + $0x10] sm:$0xff] }
 0x1d6   :  { %928 = vmatpush.bf16.msra.mxu1 %v763_v6  ;;  %v296_v53 = vmul.f32 %v292_v11, %v286_v7  ;;  %v297_v31 = vmul.f32 %v293_v18, %v285_v29  ;;  %v242_v58 = vsel %vm241_vm15, %v236_v38, %v2066_v32  ;;  %v243_v39 = vsel %vm241_vm15, %v2372_v47, %v236_v38  ;;  %v556_v38 = vld [vmem:[#allocation5 + $0x210] sm:$0xff]  ;;  %v2374_v6 = vld [vmem:[#allocation26_spill] sm:$0xff] }
 0x1d7   :  { %964 = vmatpush.bf16.msra.mxu3 %v764_v2  ;;  %v731_v51 = vpack.c.bf16 %v340_v40, %v2361_v9  ;;  %v732_v14 = vpack.c.bf16 %v341_v34, %v2362_v35  ;;  %v253_v30 = vmul.f32 %v249_v13, %v242_v58  ;;  %v571_v54 = vsel %vm570_vm12, %v2373_v26, %v569_v63 }
 0x1d8   :  { %v574_v32 = vsel %vm570_vm12, %v569_v63, %v2038_v25  ;;  %v582_v34 = vmul.f32 %v578_v1, %v571_v54  ;;  %1017 = vperm.xlu2 %1284, %v1003_v24   ;;  %vm1035_vm12 = vcmask 195584  }
 0x1d9   :  { %910 = vmatpush.bf16.msra.mxu0 %v731_v51  ;;  %946 = vmatpush.bf16.msra.mxu2 %v732_v14  ;;  %v583_v17 = vmul.f32 %v579_v28, %v574_v32  ;;  %v1254_v28 = vld [vmem:[%s2299_s5 + $0x8] sm:$0xff] }
 0x1da   :  { %929 = vmatpush.bf16.msra.mxu1 %v759_v55 }
 0x1db   :  { %965 = vmatpush.bf16.msra.mxu3 %v760_v3  ;;  %v303_v62 = vpop.permute.xlu1 %302 }
 0x1dc   :  { %v307_v57 = vsel %vm2368_vm10, %v303_v62, %v2367_v60  ;;  %v308_v41 = vsel %vm2370_vm11, %v2369_v50, %v303_v62  ;;  %v259_v23 = vpop.permute.xlu0 %258 }
 0x1dd   :  { %v318_v52 = vmul.f32 %v314_v33, %v308_v41  ;;  %v319_v8 = vmul.f32 %v315_v4, %v307_v57  ;;  %v263_v45 = vsel %vm262_vm14, %v259_v23, %v2010_v36  ;;  %v264_v16 = vsel %vm262_vm14, %v2371_v19, %v259_v23 }
 0x1de   :  { %v274_v0 = vmul.f32 %v270_v37, %v264_v16  ;;  %v275_v27 = vmul.f32 %v271_v56, %v263_v45  ;;  %v252_v36 = vmul.f32 %v248_v5, %v243_v39 }
 0x1df   :  { %v727_v20 = vpack.c.bf16 %v318_v52, %v296_v53  ;;  %v728_v42 = vpack.c.bf16 %v319_v8, %v297_v31 }
 0x1e0   :  { %v723_v44 = vpack.c.bf16 %v274_v0, %v252_v36  ;;  %v724_v40 = vpack.c.bf16 %v275_v27, %v253_v30  ;;  %v1253_v30 = vld [vmem:[%s2299_s5] sm:$0xff]  ;;  %s1389_s5 = smov [#allocation7]  }
 0x1e1   :  { %911 = vmatpush.bf16.msra.mxu0 %v727_v20  ;;  %947 = vmatpush.bf16.msra.mxu2 %v728_v42  ;;  %s1150_s23 = sshll.u32 %s1389_s5, 4  ;;  %s1151_s23 = int_to_ptr.vmem [resolvable:$true] %s1150_s23 }
 0x1e3   :  { %v547_v15 = vpop.permute.xlu1 %546 }
 0x1e4   :  { %v549_v2 = vsel %vm548_vm4, %v2374_v6, %v547_v15  ;;  %v552_v46 = vsel %vm548_vm4, %v547_v15, %v2103_v10  ;;  %v796_v55 = vpop.permute.xlu0 %795 }
 0x1e5   :  { %v560_v49 = vmul.f32 %v556_v38, %v549_v2  ;;  %v561_v9 = vmul.f32 %v557_v22, %v552_v46  ;;  %912 = vmatpush.bf16.msra.mxu0 %v723_v44  ;;  %948 = vmatpush.bf16.msra.mxu2 %v724_v40 }
 0x1e7   :  { %v755_v25 = vpack.c.bf16 %v582_v34, %v560_v49  ;;  %v756_v51 = vpack.c.bf16 %v583_v17, %v561_v9 }
 0x1e8   :  { %913 = vmatmul.bf16.vlgmr.msra.gmra.mxu0 %v1953_v61  ;;  %949 = vmatmul.bf16.vlgmr.msra.gmra.mxu2 %v1953_v61 }
 0x1e9   :  { %930 = vmatpush.bf16.msra.mxu1 %v755_v25  ;;  %966 = vmatpush.bf16.msra.mxu3 %v756_v51 }
 0x1eb   :  { %v2262_v4 = vpop.permute.xlu1 %785 }
 0x1ec   :  { %1222 = vmatmul.msk.bf16.vlgmr.msra.gmra.mxu1 %vm813_vm5, %v2092_v21  ;;  %1224 = vmatmul.msk.bf16.vlgmr.msra.gmra.mxu3 %vm813_vm5, %v2092_v21 }
 0x1f8   :  { %918 = vmatmul.bf16.gmra.mxu0 %v1998_v43  ;;  %954 = vmatmul.bf16.gmra.mxu2 %v1998_v43 }
 0x1fc   :  { %1223 = vmatmul.msk.bf16.gmra.mxu1 %vm813_vm5, %v2160_v59  ;;  %1225 = vmatmul.msk.bf16.gmra.mxu3 %vm813_vm5, %v2160_v59 }
 0x215   :  { %v878_v61 = vpop.f32.mrf.mxu2 }
 0x216   :  { %v879_v50 = vadd.f32 %v878_v61, %v2262_v4 }
 0x21d   :  { %v880_v10 = vpop.f32.mrf.mxu2 }
 0x221   :  { %v2258_v7 = vpop.permute.xlu2 %790 }
 0x222   :  { %v881_v59 = vadd.f32 %v880_v10, %v2258_v7 }
 0x225   :  { %v883_v35 = vpop.f32.mrf.mxu2 }
 0x226   :  { %v884_v3 = vadd.f32 %v883_v35, %v796_v55 }
 0x22d   :  { %v885_v14 = vpop.f32.mrf.mxu2 }
 0x239   :  { %v842_v21 = vpop.f32.mrf.mxu0 }
 0x23a   :  { %v843_v56 = vadd.f32 %v842_v21, %v2262_v4 }
 0x23f   :  { %v896_v11 = vpop.f32.mrf.mxu3 }
 0x240   :  { %v897_v8 = vadd.f32 %v896_v11, %v879_v50 }
 0x241   :  { %v844_v18 = vpop.f32.mrf.mxu0 }
 0x242   :  { %v860_v12 = vpop.f32.mrf.mxu1  ;;  %v845_v33 = vadd.f32 %v844_v18, %v2258_v7  ;;  %v978_v39 = vmax.f32 %v897_v8, 0.0 }
 0x243   :  { %v861_v19 = vadd.f32 %v860_v12, %v843_v56 }
 0x245   :  { %v977_v27 = vmax.f32 %v861_v19, 0.0 }
 0x247   :  { %v898_v43 = vpop.f32.mrf.mxu3 }
 0x248   :  { %v899_v41 = vadd.f32 %v898_v43, %v881_v59 }
 0x249   :  { %v847_v29 = vpop.f32.mrf.mxu0 }
 0x24a   :  { %v862_v48 = vpop.f32.mrf.mxu1  ;;  %v848_v62 = vadd.f32 %v847_v29, %v796_v55  ;;  %v982_v5 = vmax.f32 %v899_v41, 0.0 }
 0x24b   :  { %v863_v23 = vadd.f32 %v862_v48, %v845_v33 }
 0x24c   :  { %v994_v42 = vpack.c.bf16 %v982_v5, %v978_v39 }
 0x24d   :  { %v981_v58 = vmax.f32 %v863_v23, 0.0  ;;  %v1013_v23 = vpop.permute.xlu1 %1012 }
 0x24f   :  { %v901_v53 = vpop.f32.mrf.mxu3  ;;  %v993_v36 = vpack.c.bf16 %v981_v58, %v977_v27 }
 0x250   :  { %v902_v31 = vadd.f32 %v901_v53, %v884_v3 }
 0x251   :  { %v849_v57 = vpop.f32.mrf.mxu0 }
 0x252   :  { %v865_v60 = vpop.f32.mrf.mxu1  ;;  %v986_v52 = vmax.f32 %v902_v31, 0.0 }
 0x253   :  { %v866_v37 = vadd.f32 %v865_v60, %v848_v62 }
 0x254   :  { %v998_v16 = vpack.c.bf16 %v986_v52, %v986_v52 }
 0x255   :  { %v985_v45 = vmax.f32 %v866_v37, 0.0 }
 0x256   :  { %v1046_v47 = vsel %vm820_vm0, %v998_v16, 0  ;;  %v1018_v16 = vpop.permute.xlu2 %1017 }
 0x257   :  { %v997_v13 = vpack.c.bf16 %v985_v45, %v985_v45  ;;  %1079 = vmatpush.bf16.msrb.mxu1 %v1046_v47  ;;  %v903_v0 = vpop.f32.mrf.mxu3 }
 0x259   :  { %v1043_v63 = vsel %vm820_vm0, %v997_v13, 0 }
 0x25a   :  { %1060 = vmatpush.bf16.msrb.mxu0 %v1043_v63  ;;  %v867_v20 = vpop.f32.mrf.mxu1 }
 0x25b   :  { %1080 = vmatpush.bf16.msrb.mxu1 %v994_v42 }
 0x25e   :  { %1061 = vmatpush.bf16.msrb.mxu0 %v993_v36  ;;  %1236 = vmatmul.msk.bf16.vlgmr.msrb.gmra.mxu1 %vm1035_vm12, %v1253_v30 }
 0x261   :  { %1234 = vmatmul.msk.bf16.vlgmr.msrb.gmra.mxu0 %vm1035_vm12, %v1253_v30 }
 0x265   :  { %v914_v1 = vpop.f32.mrf.mxu0 }
 0x266   :  { %v915_v17 = vadd.f32 %v914_v1, %v2262_v4 }
 0x269   :  { %v932_v26 = vpop.f32.mrf.mxu1 }
 0x26a   :  { %v933_v51 = vadd.f32 %v932_v26, %v915_v17 }
 0x26b   :  { %v950_v54 = vpop.f32.mrf.mxu2 }
 0x26c   :  { %v979_v12 = vmax.f32 %v933_v51, 0.0  ;;  %v951_v43 = vadd.f32 %v950_v54, %v2262_v4  ;;  %v1008_v4 = vpop.permute.xlu0 %1007 }
 0x26d   :  { %v916_v32 = vpop.f32.mrf.mxu0 }
 0x26e   :  { %1237 = vmatmul.msk.bf16.gmra.mxu1 %vm1035_vm12, %v1254_v28  ;;  %v917_v6 = vadd.f32 %v916_v32, %v2258_v7 }
 0x26f   :  { %v968_v38 = vpop.f32.mrf.mxu3 }
 0x270   :  { %v969_v3 = vadd.f32 %v968_v38, %v951_v43 }
 0x271   :  { %1235 = vmatmul.msk.bf16.gmra.mxu0 %vm1035_vm12, %v1254_v28  ;;  %v934_v22 = vpop.f32.mrf.mxu1 }
 0x272   :  { %v935_v49 = vadd.f32 %v934_v22, %v917_v6 }
 0x273   :  { %v952_v15 = vpop.f32.mrf.mxu2 }
 0x274   :  { %v983_v35 = vmax.f32 %v935_v49, 0.0  ;;  %v953_v14 = vadd.f32 %v952_v15, %v2258_v7  ;;  %v980_v7 = vmax.f32 %v969_v3, 0.0  ;;  %v1023_v39 = vpop.permute.xlu0 %1022 }
 0x275   :  { %v919_v44 = vpop.f32.mrf.mxu0 }
 0x276   :  { %v920_v34 = vadd.f32 %v919_v44, %v796_v55  ;;  %v995_v33 = vpack.c.bf16 %v983_v35, %v979_v12 }
 0x277   :  { %v970_v40 = vpop.f32.mrf.mxu3 }
 0x278   :  { %v971_v29 = vadd.f32 %v970_v40, %v953_v14 }
 0x279   :  { %v937_v2 = vpop.f32.mrf.mxu1 }
 0x27a   :  { %v938_v46 = vadd.f32 %v937_v2, %v920_v34  ;;  %v984_v31 = vmax.f32 %v971_v29, 0.0 }
 0x27b   :  { %v955_v9 = vpop.f32.mrf.mxu2 }
 0x27c   :  { %v987_v25 = vmax.f32 %v938_v46, 0.0  ;;  %v956_v10 = vadd.f32 %v955_v9, %v796_v55  ;;  %v996_v57 = vpack.c.bf16 %v984_v31, %v980_v7 }
 0x27d   :  { %v921_v24 = vpop.f32.mrf.mxu0 }
 0x27e   :  { %v999_v61 = vpack.c.bf16 %v987_v25, %v987_v25 }
 0x27f   :  { %v973_v21 = vpop.f32.mrf.mxu3 }
 0x280   :  { %v974_v11 = vadd.f32 %v973_v21, %v956_v10  ;;  %v1049_v18 = vsel %vm820_vm0, %v999_v61, 0 }
 0x281   :  { %v939_v48 = vpop.f32.mrf.mxu1  ;;  %1098 = vmatpush.bf16.msrb.mxu2 %v1049_v18 }
 0x282   :  { %v988_v59 = vmax.f32 %v974_v11, 0.0 }
 0x283   :  { %v957_v62 = vpop.f32.mrf.mxu2 }
 0x284   :  { %v1000_v53 = vpack.c.bf16 %v988_v59, %v988_v59 }
 0x285   :  { %1099 = vmatpush.bf16.msrb.mxu2 %v995_v33 }
 0x286   :  { %v1052_v55 = vsel %vm820_vm0, %v1000_v53, 0 }
 0x287   :  { %v975_v60 = vpop.f32.mrf.mxu3  ;;  %1117 = vmatpush.bf16.msrb.mxu3 %v1052_v55 }
 0x288   :  { %1238 = vmatmul.msk.bf16.vlgmr.msrb.gmra.mxu2 %vm1035_vm12, %v1253_v30 }
 0x28b   :  { %1118 = vmatpush.bf16.msrb.mxu3 %v996_v57 }
 0x28e   :  { %1240 = vmatmul.msk.bf16.vlgmr.msrb.gmra.mxu3 %vm1035_vm12, %v1253_v30 }
 0x298   :  { %1239 = vmatmul.msk.bf16.gmra.mxu2 %vm1035_vm12, %v1254_v28 }
 0x29e   :  { %1241 = vmatmul.msk.bf16.gmra.mxu3 %vm1035_vm12, %v1254_v28 }
 0x2db   :  { %v1082_v50 = vpop.f32.mrf.mxu1 }
 0x2dc   :  { %v1083_v41 = vadd.f32 %v1082_v50, %v1008_v4 }
 0x2de   :  { %v1063_v37 = vpop.f32.mrf.mxu0  ;;  %1131 = vst [vmem:[#allocation7 + $0x8] sm:$0xff] %v1083_v41 }
 0x2df   :  { %v1064_v56 = vadd.f32 %v1063_v37, %v1008_v4 }
 0x2e1   :  { %1130 = vst [vmem:[#allocation7] sm:$0xff] %v1064_v56 }
 0x2e3   :  { %v1084_v52 = vpop.f32.mrf.mxu1 }
 0x2e4   :  { %v1085_v8 = vadd.f32 %v1084_v52, %v1013_v23 }
 0x2e6   :  { %v1065_v45 = vpop.f32.mrf.mxu0  ;;  %1135 = vst [vmem:[#allocation7 + $0x28] sm:$0xff] %v1085_v8 }
 0x2e7   :  { %v1066_v19 = vadd.f32 %v1065_v45, %v1013_v23 }
 0x2e9   :  { %1134 = vst [vmem:[#allocation7 + $0x20] sm:$0xff] %v1066_v19 }
 0x2eb   :  { %v1087_v5 = vpop.f32.mrf.mxu1 }
 0x2ec   :  { %v1088_v13 = vadd.f32 %v1087_v5, %v1018_v16 }
 0x2ee   :  { %v1068_v58 = vpop.f32.mrf.mxu0  ;;  %1139 = vst [vmem:[#allocation7 + $0x48] sm:$0xff] %v1088_v13 }
 0x2ef   :  { %v1069_v47 = vadd.f32 %v1068_v58, %v1018_v16 }
 0x2f1   :  { %1138 = vst [vmem:[#allocation7 + $0x40] sm:$0xff] %v1069_v47 }
 0x2f3   :  { %v1089_v63 = vpop.f32.mrf.mxu1 }
 0x2f4   :  { %v1090_v0 = vadd.f32 %v1089_v63, %v1023_v39 }
 0x2f6   :  { %v1070_v27 = vpop.f32.mrf.mxu0  ;;  %1143 = vst [vmem:[#allocation7 + $0x68] sm:$0xff] %v1090_v0 }
 0x2f7   :  { %v1071_v20 = vadd.f32 %v1070_v27, %v1023_v39 }
 0x2f9   :  { %1142 = vst [vmem:[#allocation7 + $0x60] sm:$0xff] %v1071_v20 }
 0x30b   :  { %v1101_v42 = vpop.f32.mrf.mxu2 }
 0x30c   :  { %v1102_v36 = vadd.f32 %v1101_v42, %v1008_v4 }
 0x30e   :  { %1132 = vst [vmem:[#allocation7 + $0x10] sm:$0xff] %v1102_v36 }
 0x311   :  { %v1120_v30 = vpop.f32.mrf.mxu3 }
 0x312   :  { %v1121_v1 = vadd.f32 %v1120_v30, %v1008_v4 }
 0x313   :  { %v1103_v26 = vpop.f32.mrf.mxu2 }
 0x314   :  { %1133 = vst [vmem:[#allocation7 + $0x18] sm:$0xff] %v1121_v1  ;;  %v1104_v54 = vadd.f32 %v1103_v26, %v1013_v23 }
 0x316   :  { %1136 = vst [vmem:[#allocation7 + $0x30] sm:$0xff] %v1104_v54 }
 0x319   :  { %v1122_v28 = vpop.f32.mrf.mxu3 }
 0x31a   :  { %v1123_v32 = vadd.f32 %v1122_v28, %v1013_v23 }
 0x31b   :  { %v1106_v38 = vpop.f32.mrf.mxu2 }
 0x31c   :  { %1137 = vst [vmem:[#allocation7 + $0x38] sm:$0xff] %v1123_v32  ;;  %v1107_v22 = vadd.f32 %v1106_v38, %v1018_v16 }
 0x31e   :  { %1140 = vst [vmem:[#allocation7 + $0x50] sm:$0xff] %v1107_v22 }
 0x321   :  { %v1125_v15 = vpop.f32.mrf.mxu3 }
 0x322   :  { %v1126_v44 = vadd.f32 %v1125_v15, %v1018_v16 }
 0x323   :  { %v1108_v40 = vpop.f32.mrf.mxu2 }
 0x324   :  { %1141 = vst [vmem:[#allocation7 + $0x58] sm:$0xff] %v1126_v44  ;;  %v1109_v34 = vadd.f32 %v1108_v40, %v1023_v39 }
 0x326   :  { %1144 = vst [vmem:[#allocation7 + $0x70] sm:$0xff] %v1109_v34 }
 0x329   :  { %v1127_v6 = vpop.f32.mrf.mxu3 }
 0x32a   :  { %v1128_v2 = vadd.f32 %v1127_v6, %v1023_v39 }
 0x32c   :  { %1145 = vst [vmem:[#allocation7 + $0x78] sm:$0xff] %v1128_v2 }
 0x32d   :  { %1158 = dma.vmem_to_hbm [thread:$0]  %s1151_s23, 2048, %s1153_s26, [#allocation4], %s1367_s17, %s1367_s17, %s1368_s18  }
 0x32e   :  { %1361 = dma.done.wait [#allocation4], 2048  }
 0x32f   :  { %1362 = vsyncadd [#allocation4], 4294965248 }
 0x330   :  { %1163 = vsyncpa [#allocation3], 1 }
 0x331   :  { %1164 = vsyncpa [#allocation6], 1 }
 0x332   :  { %1165 = vsyncpa [#allocation4], 1 }

</bundles_post_ra>
